<compile_context>
chip_gen: v7x
topology: tpu7x:2x2x1
jax: 0.10.0
libtpu: 0.0.40
codegen_flags: <defaults>
</compile_context>

<pallas_src>
import numpy as np

import jax
import jax.numpy as jnp
from jax.experimental import pallas as pl
from jax.experimental.pallas import tpu as pltpu


# --------------------------------------------------------------------------
# Parameter init (torch layout) and one-time packing into kernel layout.
# --------------------------------------------------------------------------
def init_params(key):
    # PyTorch-style uniform(-1/sqrt(fan_in), 1/sqrt(fan_in)), torch layouts.
    def uni(k, shape, fan_in):
        bound = 1.0 / float(fan_in) ** 0.5
        return jax.random.uniform(k, shape, jnp.float32, -bound, bound)

    ks = jax.random.split(key, 8)
    return {
        "w1": uni(ks[0], (10, 1, 5, 5), 1 * 5 * 5),
        "b1": uni(ks[1], (10,), 1 * 5 * 5),
        "w2": uni(ks[2], (20, 10, 5, 5), 10 * 5 * 5),
        "b2": uni(ks[3], (20,), 10 * 5 * 5),
        "wf1": uni(ks[4], (50, 320), 320),
        "bf1": uni(ks[5], (50,), 320),
        "wf2": uni(ks[6], (10, 50), 50),
        "bf2": uni(ks[7], (10,), 50),
    }


def pack_params(p):
    """Repack torch-layout params into the banded, lane-dense kernel layout.

    Conv1 matmul RHS  T1[w, (qx*5+ky)*128 + px*10 + oc] = w1[oc,0,ky, w-2*px-qx]
    Conv2 matmul RHS  U [px*10+ic, (qx2*5+ky)*128 + px2*20 + oc]
                                                 = w2[oc,ic,ky, px-2*px2-qx2]
    (qx/qy are the 2x2 pooling parities; px/py index the pooled grid, so the
    stride-2 pooling selection is encoded directly in the weight columns.)
    fc1 weight is permuted so it consumes the (py2-row, px2*20+oc-lane) layout,
    absorbing torch's view(B,-1) C,H,W flatten and the .T transpose.
    """
    w1, b1 = p["w1"], p["b1"]
    w2, b2 = p["w2"], p["b2"]
    wf1, bf1 = p["wf1"], p["bf1"]
    wf2, bf2 = p["wf2"], p["bf2"]

    # ---- conv1 banded matrix: (28, 2*5*128) ----
    w1s = w1[:, 0]                                      # (10, 5, 5)
    Wn = np.arange(28)[:, None, None, None, None]
    QX = np.arange(2)[None, :, None, None, None]
    KY = np.arange(5)[None, None, :, None, None]
    PX = np.arange(12)[None, None, None, :, None]
    OC = np.arange(10)[None, None, None, None, :]
    KX = Wn - 2 * PX - QX                               # (28,2,1,12,1)
    valid = (KX >= 0) & (KX <= 4)
    t1 = jnp.where(valid, w1s[OC, KY, np.clip(KX, 0, 4)], 0.0)   # (28,2,5,12,10)
    t1 = t1.reshape(28, 2, 5, 120)
    t1 = jnp.zeros((28, 2, 5, 128), jnp.float32).at[..., :120].set(t1)
    t1 = t1.reshape(28, 1280)

    # ---- conv2 banded matrix: (120, 2*5*128) ----
    PXa = np.arange(12)[:, None, None, None, None, None]
    ICa = np.arange(10)[None, :, None, None, None, None]
    QX2 = np.arange(2)[None, None, :, None, None, None]
    KYa = np.arange(5)[None, None, None, :, None, None]
    PX2 = np.arange(4)[None, None, None, None, :, None]
    OCa = np.arange(20)[None, None, None, None, None, :]
    KXa = PXa - 2 * PX2 - QX2                           # (12,1,2,1,4,1)
    valid2 = (KXa >= 0) & (KXa <= 4)
    u = jnp.where(valid2, w2[OCa, ICa, KYa, np.clip(KXa, 0, 4)], 0.0)  # (12,10,2,5,4,20)
    u = u.reshape(120, 2, 5, 80)
    u = jnp.zeros((120, 2, 5, 128), jnp.float32).at[..., :80].set(u)
    u = u.reshape(120, 1280)

    # ---- fc1: fold the (C,H,W) flatten permutation + transpose ----
    PY2 = np.arange(4)[:, None, None, None]
    PX2b = np.arange(4)[None, :, None, None]
    OCf = np.arange(20)[None, None, :, None]
    Jb = np.arange(50)[None, None, None, :]
    wf1p = wf1[Jb, OCf * 16 + PY2 * 4 + PX2b]           # (4,4,20,50)
    wf1p = wf1p.reshape(4, 80, 50)

    return {
        "t1": t1,
        "u": u,
        "wf1": wf1p,
        "wf2": wf2.T,                                   # (50, 10)
        "b1t": jnp.tile(b1, 12).reshape(1, 120),        # lane layout px*10+oc
        "b2t": jnp.tile(b2, 4).reshape(1, 80),          # lane layout px2*20+oc
        "bf1": bf1.reshape(1, 50),
        "bf2": bf2.reshape(1, 10),
    }


# --------------------------------------------------------------------------
# The single fused kernel: one image per grid step, everything VMEM-resident.
# --------------------------------------------------------------------------
def _net_kernel(xq_ref, t1_ref, u_ref, wf1_ref, wf2_ref,
                b1_ref, b2_ref, bf1_ref, bf2_ref, o_ref):
    # xq: (32, 28) row-polyphase image, row p*8+i holds input row 4*i+p.
    xq = xq_ref[0]
    z = jnp.dot(xq, t1_ref[...], preferred_element_type=jnp.float32)  # (32,1280)

    def zslab(p, ky, qx, off):
        r0 = p * 8 + off
        c0 = (qx * 5 + ky) * 128
        return z[r0:r0 + 6, c0:c0 + 120]                # (6, 120)

    # conv1 + ReLU + 2x2 max-pool; result split by pooled-row parity r.
    b1v = b1_ref[...]
    h1 = []
    for r in range(2):                                  # pooled row = 2m + r
        branch_max = None
        for qy in range(2):
            for qx in range(2):
                acc = None
                for ky in range(5):
                    t = 2 * r + qy + ky
                    s = zslab(t % 4, ky, qx, t // 4)
                    acc = s if acc is None else acc + s
                branch_max = acc if branch_max is None else jnp.maximum(branch_max, acc)
        h1.append(jnp.maximum(branch_max + b1v, 0.0))   # (6, 120): lanes px*10+ic

    # conv2 + ReLU + 2x2 max-pool.
    u = u_ref[...]
    g = [jnp.dot(h1[r], u, preferred_element_type=jnp.float32) for r in range(2)]  # (6,1280)

    b2v = b2_ref[...]
    m2 = None
    for qy2 in range(2):
        for qx2 in range(2):
            acc = None
            for ky in range(5):
                s = qy2 + ky
                c0 = (qx2 * 5 + ky) * 128
                sl = g[s % 2][s // 2:s // 2 + 4, c0:c0 + 80]
                acc = sl if acc is None else acc + sl
            m2 = acc if m2 is None else jnp.maximum(m2, acc)
    h2 = jnp.maximum(m2 + b2v, 0.0)                     # (4, 80): lanes px2*20+oc

    # fc1 (flatten permutation folded into wf1) + fc2, no activation between.
    a1 = bf1_ref[...]                                   # (1, 50)
    for py2 in range(4):
        a1 = a1 + jnp.dot(h2[py2:py2 + 1, :], wf1_ref[py2],
                          preferred_element_type=jnp.float32)
    out = bf2_ref[...] + jnp.dot(a1, wf2_ref[...],
                                 preferred_element_type=jnp.float32)  # (1, 10)
    o_ref[0] = out


def net_forward(x_nchw, pk):
    # x_nchw: (B, 1, 28, 28) float32 (PyTorch input convention).
    B = x_nchw.shape[0]
    img = x_nchw[:, 0]                                   # (B, 28, 28)
    # Row-polyphase layout: row p*8 + i <- input row 4*i + p (pad 28 -> 32).
    xp = jnp.pad(img, ((0, 0), (0, 4), (0, 0)))
    xq = jnp.transpose(xp.reshape(B, 8, 4, 28), (0, 2, 1, 3)).reshape(B, 32, 28)

    out = pl.pallas_call(
        _net_kernel,
        out_shape=jax.ShapeDtypeStruct((B, 1, 10), jnp.float32),
        grid=(B,),
        in_specs=[
            pl.BlockSpec((1, 32, 28), lambda b: (b, 0, 0)),   # per-image input
            pl.BlockSpec((28, 1280), lambda b: (0, 0)),       # conv1 weights
            pl.BlockSpec((120, 1280), lambda b: (0, 0)),      # conv2 weights
            pl.BlockSpec((4, 80, 50), lambda b: (0, 0, 0)),   # fc1 weights
            pl.BlockSpec((50, 10), lambda b: (0, 0)),         # fc2 weights
            pl.BlockSpec((1, 120), lambda b: (0, 0)),         # conv1 bias
            pl.BlockSpec((1, 80), lambda b: (0, 0)),          # conv2 bias
            pl.BlockSpec((1, 50), lambda b: (0, 0)),          # fc1 bias
            pl.BlockSpec((1, 10), lambda b: (0, 0)),          # fc2 bias
        ],
        out_specs=pl.BlockSpec((1, 1, 10), lambda b: (b, 0, 0)),
        compiler_params=pltpu.CompilerParams(
            dimension_semantics=("parallel",)),
    )(xq, pk["t1"], pk["u"], pk["wf1"], pk["wf2"],
      pk["b1t"], pk["b2t"], pk["bf1"], pk["bf2"])
    return out.reshape(B, 10)


# --------------------------------------------------------------------------
# Pure-JAX reference of the torch module (for the built-in numerics check).
# --------------------------------------------------------------------------
def reference_forward(x, p):
    dn = ("NCHW", "OIHW", "NCHW")
    y = jax.lax.conv_general_dilated(x, p["w1"], (1, 1), "VALID",
                                     dimension_numbers=dn)
    y = jnp.maximum(y + p["b1"].reshape(1, -1, 1, 1), 0.0)
    y = jax.lax.reduce_window(y, -jnp.inf, jax.lax.max,
                              (1, 1, 2, 2), (1, 1, 2, 2), "VALID")
    y = jax.lax.conv_general_dilated(y, p["w2"], (1, 1), "VALID",
                                     dimension_numbers=dn)
    y = jnp.maximum(y + p["b2"].reshape(1, -1, 1, 1), 0.0)
    y = jax.lax.reduce_window(y, -jnp.inf, jax.lax.max,
                              (1, 1, 2, 2), (1, 1, 2, 2), "VALID")
    y = y.reshape(x.shape[0], -1)                        # torch view(B,-1): C,H,W
    y = y @ p["wf1"].T + p["bf1"]
    y = y @ p["wf2"].T + p["bf2"]
    return y


if __name__ == "__main__":
    key = jax.random.PRNGKey(0)
    k_param, k_x = jax.random.split(key)
    params = init_params(k_param)
    packed = pack_params(params)                         # one-time weight packing

    # MNIST-shaped input is required by the module (fc expects 320 = 20*4*4).
    x = jax.random.normal(k_x, (2, 1, 28, 28), jnp.float32)

    out = jax.jit(net_forward)(x, packed)
    jax.block_until_ready(out)
    assert out.shape == (2, 10) and out.dtype == jnp.float32

    with jax.default_matmul_precision("highest"):
        ref = reference_forward(x, params)
    err = float(jnp.max(jnp.abs(out - ref)))
    assert err < 5e-3, f"mismatch vs reference: max abs err = {err}"
    print("KERNEL_OK")
</pallas_src>

<mosaic_0001>
module attributes {stable_mosaic.version = 11 : i64} {
  func.func @_net_kernel(%arg0: i32, %arg1: memref<1x32x28xf32, #tpu.memory_space<vmem>>, %arg2: memref<28x1280xf32, #tpu.memory_space<vmem>>, %arg3: memref<120x1280xf32, #tpu.memory_space<vmem>>, %arg4: memref<4x80x50xf32, #tpu.memory_space<vmem>>, %arg5: memref<50x10xf32, #tpu.memory_space<vmem>>, %arg6: memref<1x120xf32, #tpu.memory_space<vmem>>, %arg7: memref<1x80xf32, #tpu.memory_space<vmem>>, %arg8: memref<1x50xf32, #tpu.memory_space<vmem>>, %arg9: memref<1x10xf32, #tpu.memory_space<vmem>>, %arg10: memref<1x1x10xf32, #tpu.memory_space<vmem>>) attributes {dimension_semantics = [#tpu.dimension_semantics<parallel>], iteration_bounds = array<i64: 2>, scalar_prefetch = 0 : i64, scratch_operands = 0 : i64, tpu.core_type = #tpu.core_type<tc>, window_params = [{transform_indices = @transform_0, window_bounds = array<i64: 1, 32, 28>}, {pipeline_mode = #tpu.pipeline_mode<synchronous>, transform_indices = @transform_1, window_bounds = array<i64: 28, 1280>}, {pipeline_mode = #tpu.pipeline_mode<synchronous>, transform_indices = @transform_2, window_bounds = array<i64: 120, 1280>}, {pipeline_mode = #tpu.pipeline_mode<synchronous>, transform_indices = @transform_3, window_bounds = array<i64: 4, 80, 50>}, {pipeline_mode = #tpu.pipeline_mode<synchronous>, transform_indices = @transform_4, window_bounds = array<i64: 50, 10>}, {pipeline_mode = #tpu.pipeline_mode<synchronous>, transform_indices = @transform_5, window_bounds = array<i64: 1, 120>}, {pipeline_mode = #tpu.pipeline_mode<synchronous>, transform_indices = @transform_6, window_bounds = array<i64: 1, 80>}, {pipeline_mode = #tpu.pipeline_mode<synchronous>, transform_indices = @transform_7, window_bounds = array<i64: 1, 50>}, {pipeline_mode = #tpu.pipeline_mode<synchronous>, transform_indices = @transform_8, window_bounds = array<i64: 1, 10>}, {transform_indices = @transform_9, window_bounds = array<i64: 1, 1, 10>}]} {
    %c0 = arith.constant 0 : index
    %c0_0 = arith.constant 0 : index
    %c0_1 = arith.constant 0 : index
    %0 = vector.load %arg1[%c0, %c0_0, %c0_1] : memref<1x32x28xf32, #tpu.memory_space<vmem>>, vector<1x32x28xf32>
    %1 = vector.shape_cast %0 : vector<1x32x28xf32> to vector<32x28xf32>
    %c0_2 = arith.constant 0 : index
    %c0_3 = arith.constant 0 : index
    %2 = vector.load %arg2[%c0_2, %c0_3] : memref<28x1280xf32, #tpu.memory_space<vmem>>, vector<28x1280xf32>
    %cst = arith.constant dense<0.000000e+00> : vector<32x1280xf32>
    %3 = tpu.matmul %1, %2, %cst {dimension_numbers = #tpu.dot_dimension_numbers<[1], [0], [0], [1], [0, 0, 1, 1], [], []>} : vector<32x28xf32>, vector<28x1280xf32>, vector<32x1280xf32> -> vector<32x1280xf32>
    %c0_4 = arith.constant 0 : index
    %c0_5 = arith.constant 0 : index
    %4 = vector.load %arg6[%c0_4, %c0_5] : memref<1x120xf32, #tpu.memory_space<vmem>>, vector<1x120xf32>
    %5 = vector.extract_strided_slice %3 {offsets = [0, 0], sizes = [6, 120], strides = [1, 1]} : vector<32x1280xf32> to vector<6x120xf32>
    %6 = vector.extract_strided_slice %3 {offsets = [8, 128], sizes = [6, 120], strides = [1, 1]} : vector<32x1280xf32> to vector<6x120xf32>
    %7 = arith.addf %5, %6 : vector<6x120xf32>
    %8 = vector.extract_strided_slice %3 {offsets = [16, 256], sizes = [6, 120], strides = [1, 1]} : vector<32x1280xf32> to vector<6x120xf32>
    %9 = arith.addf %7, %8 : vector<6x120xf32>
    %10 = vector.extract_strided_slice %3 {offsets = [24, 384], sizes = [6, 120], strides = [1, 1]} : vector<32x1280xf32> to vector<6x120xf32>
    %11 = arith.addf %9, %10 : vector<6x120xf32>
    %12 = vector.extract_strided_slice %3 {offsets = [1, 512], sizes = [6, 120], strides = [1, 1]} : vector<32x1280xf32> to vector<6x120xf32>
    %13 = arith.addf %11, %12 : vector<6x120xf32>
    %14 = vector.extract_strided_slice %3 {offsets = [0, 640], sizes = [6, 120], strides = [1, 1]} : vector<32x1280xf32> to vector<6x120xf32>
    %15 = vector.extract_strided_slice %3 {offsets = [8, 768], sizes = [6, 120], strides = [1, 1]} : vector<32x1280xf32> to vector<6x120xf32>
    %16 = arith.addf %14, %15 : vector<6x120xf32>
    %17 = vector.extract_strided_slice %3 {offsets = [16, 896], sizes = [6, 120], strides = [1, 1]} : vector<32x1280xf32> to vector<6x120xf32>
    %18 = arith.addf %16, %17 : vector<6x120xf32>
    %19 = vector.extract_strided_slice %3 {offsets = [24, 1024], sizes = [6, 120], strides = [1, 1]} : vector<32x1280xf32> to vector<6x120xf32>
    %20 = arith.addf %18, %19 : vector<6x120xf32>
    %21 = vector.extract_strided_slice %3 {offsets = [1, 1152], sizes = [6, 120], strides = [1, 1]} : vector<32x1280xf32> to vector<6x120xf32>
    %22 = arith.addf %20, %21 : vector<6x120xf32>
    %23 = arith.maximumf %13, %22 : vector<6x120xf32>
    %24 = vector.extract_strided_slice %3 {offsets = [8, 0], sizes = [6, 120], strides = [1, 1]} : vector<32x1280xf32> to vector<6x120xf32>
    %25 = vector.extract_strided_slice %3 {offsets = [16, 128], sizes = [6, 120], strides = [1, 1]} : vector<32x1280xf32> to vector<6x120xf32>
    %26 = arith.addf %24, %25 : vector<6x120xf32>
    %27 = vector.extract_strided_slice %3 {offsets = [24, 256], sizes = [6, 120], strides = [1, 1]} : vector<32x1280xf32> to vector<6x120xf32>
    %28 = arith.addf %26, %27 : vector<6x120xf32>
    %29 = vector.extract_strided_slice %3 {offsets = [1, 384], sizes = [6, 120], strides = [1, 1]} : vector<32x1280xf32> to vector<6x120xf32>
    %30 = arith.addf %28, %29 : vector<6x120xf32>
    %31 = vector.extract_strided_slice %3 {offsets = [9, 512], sizes = [6, 120], strides = [1, 1]} : vector<32x1280xf32> to vector<6x120xf32>
    %32 = arith.addf %30, %31 : vector<6x120xf32>
    %33 = arith.maximumf %23, %32 : vector<6x120xf32>
    %34 = vector.extract_strided_slice %3 {offsets = [8, 640], sizes = [6, 120], strides = [1, 1]} : vector<32x1280xf32> to vector<6x120xf32>
    %35 = vector.extract_strided_slice %3 {offsets = [16, 768], sizes = [6, 120], strides = [1, 1]} : vector<32x1280xf32> to vector<6x120xf32>
    %36 = arith.addf %34, %35 : vector<6x120xf32>
    %37 = vector.extract_strided_slice %3 {offsets = [24, 896], sizes = [6, 120], strides = [1, 1]} : vector<32x1280xf32> to vector<6x120xf32>
    %38 = arith.addf %36, %37 : vector<6x120xf32>
    %39 = vector.extract_strided_slice %3 {offsets = [1, 1024], sizes = [6, 120], strides = [1, 1]} : vector<32x1280xf32> to vector<6x120xf32>
    %40 = arith.addf %38, %39 : vector<6x120xf32>
    %41 = vector.extract_strided_slice %3 {offsets = [9, 1152], sizes = [6, 120], strides = [1, 1]} : vector<32x1280xf32> to vector<6x120xf32>
    %42 = arith.addf %40, %41 : vector<6x120xf32>
    %43 = arith.maximumf %33, %42 : vector<6x120xf32>
    %44 = vector.broadcast %4 : vector<1x120xf32> to vector<6x120xf32>
    %45 = arith.addf %43, %44 : vector<6x120xf32>
    %cst_6 = arith.constant 0.000000e+00 : f32
    %46 = vector.broadcast %cst_6 : f32 to vector<6x120xf32>
    %47 = arith.maximumf %45, %46 : vector<6x120xf32>
    %48 = vector.extract_strided_slice %3 {offsets = [16, 0], sizes = [6, 120], strides = [1, 1]} : vector<32x1280xf32> to vector<6x120xf32>
    %49 = vector.extract_strided_slice %3 {offsets = [24, 128], sizes = [6, 120], strides = [1, 1]} : vector<32x1280xf32> to vector<6x120xf32>
    %50 = arith.addf %48, %49 : vector<6x120xf32>
    %51 = vector.extract_strided_slice %3 {offsets = [1, 256], sizes = [6, 120], strides = [1, 1]} : vector<32x1280xf32> to vector<6x120xf32>
    %52 = arith.addf %50, %51 : vector<6x120xf32>
    %53 = vector.extract_strided_slice %3 {offsets = [9, 384], sizes = [6, 120], strides = [1, 1]} : vector<32x1280xf32> to vector<6x120xf32>
    %54 = arith.addf %52, %53 : vector<6x120xf32>
    %55 = vector.extract_strided_slice %3 {offsets = [17, 512], sizes = [6, 120], strides = [1, 1]} : vector<32x1280xf32> to vector<6x120xf32>
    %56 = arith.addf %54, %55 : vector<6x120xf32>
    %57 = vector.extract_strided_slice %3 {offsets = [16, 640], sizes = [6, 120], strides = [1, 1]} : vector<32x1280xf32> to vector<6x120xf32>
    %58 = vector.extract_strided_slice %3 {offsets = [24, 768], sizes = [6, 120], strides = [1, 1]} : vector<32x1280xf32> to vector<6x120xf32>
    %59 = arith.addf %57, %58 : vector<6x120xf32>
    %60 = vector.extract_strided_slice %3 {offsets = [1, 896], sizes = [6, 120], strides = [1, 1]} : vector<32x1280xf32> to vector<6x120xf32>
    %61 = arith.addf %59, %60 : vector<6x120xf32>
    %62 = vector.extract_strided_slice %3 {offsets = [9, 1024], sizes = [6, 120], strides = [1, 1]} : vector<32x1280xf32> to vector<6x120xf32>
    %63 = arith.addf %61, %62 : vector<6x120xf32>
    %64 = vector.extract_strided_slice %3 {offsets = [17, 1152], sizes = [6, 120], strides = [1, 1]} : vector<32x1280xf32> to vector<6x120xf32>
    %65 = arith.addf %63, %64 : vector<6x120xf32>
    %66 = arith.maximumf %56, %65 : vector<6x120xf32>
    %67 = vector.extract_strided_slice %3 {offsets = [24, 0], sizes = [6, 120], strides = [1, 1]} : vector<32x1280xf32> to vector<6x120xf32>
    %68 = vector.extract_strided_slice %3 {offsets = [1, 128], sizes = [6, 120], strides = [1, 1]} : vector<32x1280xf32> to vector<6x120xf32>
    %69 = arith.addf %67, %68 : vector<6x120xf32>
    %70 = vector.extract_strided_slice %3 {offsets = [9, 256], sizes = [6, 120], strides = [1, 1]} : vector<32x1280xf32> to vector<6x120xf32>
    %71 = arith.addf %69, %70 : vector<6x120xf32>
    %72 = vector.extract_strided_slice %3 {offsets = [17, 384], sizes = [6, 120], strides = [1, 1]} : vector<32x1280xf32> to vector<6x120xf32>
    %73 = arith.addf %71, %72 : vector<6x120xf32>
    %74 = vector.extract_strided_slice %3 {offsets = [25, 512], sizes = [6, 120], strides = [1, 1]} : vector<32x1280xf32> to vector<6x120xf32>
    %75 = arith.addf %73, %74 : vector<6x120xf32>
    %76 = arith.maximumf %66, %75 : vector<6x120xf32>
    %77 = vector.extract_strided_slice %3 {offsets = [24, 640], sizes = [6, 120], strides = [1, 1]} : vector<32x1280xf32> to vector<6x120xf32>
    %78 = vector.extract_strided_slice %3 {offsets = [1, 768], sizes = [6, 120], strides = [1, 1]} : vector<32x1280xf32> to vector<6x120xf32>
    %79 = arith.addf %77, %78 : vector<6x120xf32>
    %80 = vector.extract_strided_slice %3 {offsets = [9, 896], sizes = [6, 120], strides = [1, 1]} : vector<32x1280xf32> to vector<6x120xf32>
    %81 = arith.addf %79, %80 : vector<6x120xf32>
    %82 = vector.extract_strided_slice %3 {offsets = [17, 1024], sizes = [6, 120], strides = [1, 1]} : vector<32x1280xf32> to vector<6x120xf32>
    %83 = arith.addf %81, %82 : vector<6x120xf32>
    %84 = vector.extract_strided_slice %3 {offsets = [25, 1152], sizes = [6, 120], strides = [1, 1]} : vector<32x1280xf32> to vector<6x120xf32>
    %85 = arith.addf %83, %84 : vector<6x120xf32>
    %86 = arith.maximumf %76, %85 : vector<6x120xf32>
    %87 = vector.broadcast %4 : vector<1x120xf32> to vector<6x120xf32>
    %88 = arith.addf %86, %87 : vector<6x120xf32>
    %cst_7 = arith.constant 0.000000e+00 : f32
    %89 = vector.broadcast %cst_7 : f32 to vector<6x120xf32>
    %90 = arith.maximumf %88, %89 : vector<6x120xf32>
    %c0_8 = arith.constant 0 : index
    %c0_9 = arith.constant 0 : index
    %91 = vector.load %arg3[%c0_8, %c0_9] : memref<120x1280xf32, #tpu.memory_space<vmem>>, vector<120x1280xf32>
    %cst_10 = arith.constant dense<0.000000e+00> : vector<6x1280xf32>
    %92 = tpu.matmul %47, %91, %cst_10 {dimension_numbers = #tpu.dot_dimension_numbers<[1], [0], [0], [1], [0, 0, 1, 1], [], []>} : vector<6x120xf32>, vector<120x1280xf32>, vector<6x1280xf32> -> vector<6x1280xf32>
    %cst_11 = arith.constant dense<0.000000e+00> : vector<6x1280xf32>
    %93 = tpu.matmul %90, %91, %cst_11 {dimension_numbers = #tpu.dot_dimension_numbers<[1], [0], [0], [1], [0, 0, 1, 1], [], []>} : vector<6x120xf32>, vector<120x1280xf32>, vector<6x1280xf32> -> vector<6x1280xf32>
    %c0_12 = arith.constant 0 : index
    %c0_13 = arith.constant 0 : index
    %94 = vector.load %arg7[%c0_12, %c0_13] : memref<1x80xf32, #tpu.memory_space<vmem>>, vector<1x80xf32>
    %95 = vector.extract_strided_slice %92 {offsets = [0, 0], sizes = [4, 80], strides = [1, 1]} : vector<6x1280xf32> to vector<4x80xf32>
    %96 = vector.extract_strided_slice %93 {offsets = [0, 128], sizes = [4, 80], strides = [1, 1]} : vector<6x1280xf32> to vector<4x80xf32>
    %97 = arith.addf %95, %96 : vector<4x80xf32>
    %98 = vector.extract_strided_slice %92 {offsets = [1, 256], sizes = [4, 80], strides = [1, 1]} : vector<6x1280xf32> to vector<4x80xf32>
    %99 = arith.addf %97, %98 : vector<4x80xf32>
    %100 = vector.extract_strided_slice %93 {offsets = [1, 384], sizes = [4, 80], strides = [1, 1]} : vector<6x1280xf32> to vector<4x80xf32>
    %101 = arith.addf %99, %100 : vector<4x80xf32>
    %102 = vector.extract_strided_slice %92 {offsets = [2, 512], sizes = [4, 80], strides = [1, 1]} : vector<6x1280xf32> to vector<4x80xf32>
    %103 = arith.addf %101, %102 : vector<4x80xf32>
    %104 = vector.extract_strided_slice %92 {offsets = [0, 640], sizes = [4, 80], strides = [1, 1]} : vector<6x1280xf32> to vector<4x80xf32>
    %105 = vector.extract_strided_slice %93 {offsets = [0, 768], sizes = [4, 80], strides = [1, 1]} : vector<6x1280xf32> to vector<4x80xf32>
    %106 = arith.addf %104, %105 : vector<4x80xf32>
    %107 = vector.extract_strided_slice %92 {offsets = [1, 896], sizes = [4, 80], strides = [1, 1]} : vector<6x1280xf32> to vector<4x80xf32>
    %108 = arith.addf %106, %107 : vector<4x80xf32>
    %109 = vector.extract_strided_slice %93 {offsets = [1, 1024], sizes = [4, 80], strides = [1, 1]} : vector<6x1280xf32> to vector<4x80xf32>
    %110 = arith.addf %108, %109 : vector<4x80xf32>
    %111 = vector.extract_strided_slice %92 {offsets = [2, 1152], sizes = [4, 80], strides = [1, 1]} : vector<6x1280xf32> to vector<4x80xf32>
    %112 = arith.addf %110, %111 : vector<4x80xf32>
    %113 = arith.maximumf %103, %112 : vector<4x80xf32>
    %114 = vector.extract_strided_slice %93 {offsets = [0, 0], sizes = [4, 80], strides = [1, 1]} : vector<6x1280xf32> to vector<4x80xf32>
    %115 = vector.extract_strided_slice %92 {offsets = [1, 128], sizes = [4, 80], strides = [1, 1]} : vector<6x1280xf32> to vector<4x80xf32>
    %116 = arith.addf %114, %115 : vector<4x80xf32>
    %117 = vector.extract_strided_slice %93 {offsets = [1, 256], sizes = [4, 80], strides = [1, 1]} : vector<6x1280xf32> to vector<4x80xf32>
    %118 = arith.addf %116, %117 : vector<4x80xf32>
    %119 = vector.extract_strided_slice %92 {offsets = [2, 384], sizes = [4, 80], strides = [1, 1]} : vector<6x1280xf32> to vector<4x80xf32>
    %120 = arith.addf %118, %119 : vector<4x80xf32>
    %121 = vector.extract_strided_slice %93 {offsets = [2, 512], sizes = [4, 80], strides = [1, 1]} : vector<6x1280xf32> to vector<4x80xf32>
    %122 = arith.addf %120, %121 : vector<4x80xf32>
    %123 = arith.maximumf %113, %122 : vector<4x80xf32>
    %124 = vector.extract_strided_slice %93 {offsets = [0, 640], sizes = [4, 80], strides = [1, 1]} : vector<6x1280xf32> to vector<4x80xf32>
    %125 = vector.extract_strided_slice %92 {offsets = [1, 768], sizes = [4, 80], strides = [1, 1]} : vector<6x1280xf32> to vector<4x80xf32>
    %126 = arith.addf %124, %125 : vector<4x80xf32>
    %127 = vector.extract_strided_slice %93 {offsets = [1, 896], sizes = [4, 80], strides = [1, 1]} : vector<6x1280xf32> to vector<4x80xf32>
    %128 = arith.addf %126, %127 : vector<4x80xf32>
    %129 = vector.extract_strided_slice %92 {offsets = [2, 1024], sizes = [4, 80], strides = [1, 1]} : vector<6x1280xf32> to vector<4x80xf32>
    %130 = arith.addf %128, %129 : vector<4x80xf32>
    %131 = vector.extract_strided_slice %93 {offsets = [2, 1152], sizes = [4, 80], strides = [1, 1]} : vector<6x1280xf32> to vector<4x80xf32>
    %132 = arith.addf %130, %131 : vector<4x80xf32>
    %133 = arith.maximumf %123, %132 : vector<4x80xf32>
    %134 = vector.broadcast %94 : vector<1x80xf32> to vector<4x80xf32>
    %135 = arith.addf %133, %134 : vector<4x80xf32>
    %cst_14 = arith.constant 0.000000e+00 : f32
    %136 = vector.broadcast %cst_14 : f32 to vector<4x80xf32>
    %137 = arith.maximumf %135, %136 : vector<4x80xf32>
    %c0_15 = arith.constant 0 : index
    %c0_16 = arith.constant 0 : index
    %138 = vector.load %arg8[%c0_15, %c0_16] : memref<1x50xf32, #tpu.memory_space<vmem>>, vector<1x50xf32>
    %139 = vector.extract_strided_slice %137 {offsets = [0, 0], sizes = [1, 80], strides = [1, 1]} : vector<4x80xf32> to vector<1x80xf32>
    %c0_17 = arith.constant 0 : index
    %c0_18 = arith.constant 0 : index
    %c0_19 = arith.constant 0 : index
    %140 = vector.load %arg4[%c0_17, %c0_18, %c0_19] : memref<4x80x50xf32, #tpu.memory_space<vmem>>, vector<1x80x50xf32>
    %141 = vector.shape_cast %140 : vector<1x80x50xf32> to vector<80x50xf32>
    %cst_20 = arith.constant dense<0.000000e+00> : vector<1x50xf32>
    %142 = tpu.matmul %139, %141, %cst_20 {dimension_numbers = #tpu.dot_dimension_numbers<[1], [0], [0], [1], [0, 0, 1, 1], [], []>} : vector<1x80xf32>, vector<80x50xf32>, vector<1x50xf32> -> vector<1x50xf32>
    %143 = arith.addf %138, %142 : vector<1x50xf32>
    %144 = vector.extract_strided_slice %137 {offsets = [1, 0], sizes = [1, 80], strides = [1, 1]} : vector<4x80xf32> to vector<1x80xf32>
    %c1 = arith.constant 1 : index
    %c0_21 = arith.constant 0 : index
    %c0_22 = arith.constant 0 : index
    %145 = vector.load %arg4[%c1, %c0_21, %c0_22] : memref<4x80x50xf32, #tpu.memory_space<vmem>>, vector<1x80x50xf32>
    %146 = vector.shape_cast %145 : vector<1x80x50xf32> to vector<80x50xf32>
    %cst_23 = arith.constant dense<0.000000e+00> : vector<1x50xf32>
    %147 = tpu.matmul %144, %146, %cst_23 {dimension_numbers = #tpu.dot_dimension_numbers<[1], [0], [0], [1], [0, 0, 1, 1], [], []>} : vector<1x80xf32>, vector<80x50xf32>, vector<1x50xf32> -> vector<1x50xf32>
    %148 = arith.addf %143, %147 : vector<1x50xf32>
    %149 = vector.extract_strided_slice %137 {offsets = [2, 0], sizes = [1, 80], strides = [1, 1]} : vector<4x80xf32> to vector<1x80xf32>
    %c2 = arith.constant 2 : index
    %c0_24 = arith.constant 0 : index
    %c0_25 = arith.constant 0 : index
    %150 = vector.load %arg4[%c2, %c0_24, %c0_25] : memref<4x80x50xf32, #tpu.memory_space<vmem>>, vector<1x80x50xf32>
    %151 = vector.shape_cast %150 : vector<1x80x50xf32> to vector<80x50xf32>
    %cst_26 = arith.constant dense<0.000000e+00> : vector<1x50xf32>
    %152 = tpu.matmul %149, %151, %cst_26 {dimension_numbers = #tpu.dot_dimension_numbers<[1], [0], [0], [1], [0, 0, 1, 1], [], []>} : vector<1x80xf32>, vector<80x50xf32>, vector<1x50xf32> -> vector<1x50xf32>
    %153 = arith.addf %148, %152 : vector<1x50xf32>
    %154 = vector.extract_strided_slice %137 {offsets = [3, 0], sizes = [1, 80], strides = [1, 1]} : vector<4x80xf32> to vector<1x80xf32>
    %c3 = arith.constant 3 : index
    %c0_27 = arith.constant 0 : index
    %c0_28 = arith.constant 0 : index
    %155 = vector.load %arg4[%c3, %c0_27, %c0_28] : memref<4x80x50xf32, #tpu.memory_space<vmem>>, vector<1x80x50xf32>
    %156 = vector.shape_cast %155 : vector<1x80x50xf32> to vector<80x50xf32>
    %cst_29 = arith.constant dense<0.000000e+00> : vector<1x50xf32>
    %157 = tpu.matmul %154, %156, %cst_29 {dimension_numbers = #tpu.dot_dimension_numbers<[1], [0], [0], [1], [0, 0, 1, 1], [], []>} : vector<1x80xf32>, vector<80x50xf32>, vector<1x50xf32> -> vector<1x50xf32>
    %158 = arith.addf %153, %157 : vector<1x50xf32>
    %c0_30 = arith.constant 0 : index
    %c0_31 = arith.constant 0 : index
    %159 = vector.load %arg9[%c0_30, %c0_31] : memref<1x10xf32, #tpu.memory_space<vmem>>, vector<1x10xf32>
    %c0_32 = arith.constant 0 : index
    %c0_33 = arith.constant 0 : index
    %160 = vector.load %arg5[%c0_32, %c0_33] : memref<50x10xf32, #tpu.memory_space<vmem>>, vector<50x10xf32>
    %cst_34 = arith.constant dense<0.000000e+00> : vector<1x10xf32>
    %161 = tpu.matmul %158, %160, %cst_34 {dimension_numbers = #tpu.dot_dimension_numbers<[1], [0], [0], [1], [0, 0, 1, 1], [], []>} : vector<1x50xf32>, vector<50x10xf32>, vector<1x10xf32> -> vector<1x10xf32>
    %162 = arith.addf %159, %161 : vector<1x10xf32>
    %c0_35 = arith.constant 0 : index
    %c0_36 = arith.constant 0 : index
    %c0_37 = arith.constant 0 : index
    %163 = vector.load %arg10[%c0_35, %c0_36, %c0_37] : memref<1x1x10xf32, #tpu.memory_space<vmem>>, vector<1x1x10xf32>
    %164 = vector.shape_cast %163 : vector<1x1x10xf32> to vector<1x10xf32>
    %165 = vector.shape_cast %162 : vector<1x10xf32> to vector<1x1x10xf32>
    tpu.vector_store %arg10[%c0_35, %c0_36, %c0_37], %165 {strides = array<i32>} : memref<1x1x10xf32, #tpu.memory_space<vmem>>, vector<1x1x10xf32>,
    return
  }
  func.func @transform_0(%arg0: i32) -> (i32, i32, i32) {
    %c0_i32 = arith.constant 0 : i32
    %c0_i32_0 = arith.constant 0 : i32
    %c0_i32_1 = arith.constant 0 : i32
    return %arg0, %c0_i32, %c0_i32_0 : i32, i32, i32
  }
  func.func @transform_1(%arg0: i32) -> (i32, i32) {
    %c0_i32 = arith.constant 0 : i32
    %c0_i32_0 = arith.constant 0 : i32
    %c0_i32_1 = arith.constant 0 : i32
    return %c0_i32, %c0_i32_0 : i32, i32
  }
  func.func @transform_2(%arg0: i32) -> (i32, i32) {
    %c0_i32 = arith.constant 0 : i32
    %c0_i32_0 = arith.constant 0 : i32
    %c0_i32_1 = arith.constant 0 : i32
    return %c0_i32, %c0_i32_0 : i32, i32
  }
  func.func @transform_3(%arg0: i32) -> (i32, i32, i32) {
    %c0_i32 = arith.constant 0 : i32
    %c0_i32_0 = arith.constant 0 : i32
    %c0_i32_1 = arith.constant 0 : i32
    %c0_i32_2 = arith.constant 0 : i32
    return %c0_i32, %c0_i32_0, %c0_i32_1 : i32, i32, i32
  }
  func.func @transform_4(%arg0: i32) -> (i32, i32) {
    %c0_i32 = arith.constant 0 : i32
    %c0_i32_0 = arith.constant 0 : i32
    %c0_i32_1 = arith.constant 0 : i32
    return %c0_i32, %c0_i32_0 : i32, i32
  }
  func.func @transform_5(%arg0: i32) -> (i32, i32) {
    %c0_i32 = arith.constant 0 : i32
    %c0_i32_0 = arith.constant 0 : i32
    %c0_i32_1 = arith.constant 0 : i32
    return %c0_i32, %c0_i32_0 : i32, i32
  }
  func.func @transform_6(%arg0: i32) -> (i32, i32) {
    %c0_i32 = arith.constant 0 : i32
    %c0_i32_0 = arith.constant 0 : i32
    %c0_i32_1 = arith.constant 0 : i32
    return %c0_i32, %c0_i32_0 : i32, i32
  }
  func.func @transform_7(%arg0: i32) -> (i32, i32) {
    %c0_i32 = arith.constant 0 : i32
    %c0_i32_0 = arith.constant 0 : i32
    %c0_i32_1 = arith.constant 0 : i32
    return %c0_i32, %c0_i32_0 : i32, i32
  }
  func.func @transform_8(%arg0: i32) -> (i32, i32) {
    %c0_i32 = arith.constant 0 : i32
    %c0_i32_0 = arith.constant 0 : i32
    %c0_i32_1 = arith.constant 0 : i32
    return %c0_i32, %c0_i32_0 : i32, i32
  }
  func.func @transform_9(%arg0: i32) -> (i32, i32, i32) {
    %c0_i32 = arith.constant 0 : i32
    %c0_i32_0 = arith.constant 0 : i32
    %c0_i32_1 = arith.constant 0 : i32
    return %arg0, %c0_i32, %c0_i32_0 : i32, i32, i32
  }
}

</mosaic_0001>

<bundles_post_ra>
// kernel: net_forward.1
= control target key start
LH: loop header
LB: loop body
LE: loop exit
PB: predicated region body
PF: predicated region fallthrough
CT: control target
= control target key end

     0   :  { %s4202_s0 = inlined_call_operand.vmem [shape: f32[2,32,28], index: 0, kind: input, shape index: {}]   ;;  %s4203_s1 = inlined_call_operand.vmem [shape: f32[28,1280], index: 1, kind: input, shape index: {}]   ;;  %s4204_s2 = inlined_call_operand.hbm [shape: f32[120,1280], index: 2, kind: input, shape index: {}]   ;;  %s4205_s3 = inlined_call_operand.vmem [shape: f32[4,80,50], index: 3, kind: input, shape index: {}]   ;;  %s4206_s4 = inlined_call_operand.vmem [shape: f32[50,10], index: 4, kind: input, shape index: {}]   ;;  %s4207_s5 = inlined_call_operand.vmem [shape: f32[1,120], index: 5, kind: input, shape index: {}]   ;;  %s4208_s6 = inlined_call_operand.vmem [shape: f32[1,80], index: 6, kind: input, shape index: {}]   ;;  %s4209_s7 = inlined_call_operand.vmem [shape: f32[1,50], index: 7, kind: input, shape index: {}]   ;;  %s4210_s8 = inlined_call_operand.vmem [shape: f32[1,10], index: 8, kind: input, shape index: {}]   ;;  %s4211_s9 = inlined_call_operand.hbm [shape: f32[2,1,10], index: 9, kind: output, shape index: {}]  }
   0x1   :  { %4238 = sst [smem:[#allocation29_spill]] %s4202_s0 }
   0x2   :  { %14 = vsyncpa [#allocation3], 0 }
   0x3   :  { %15 = vsyncpa [#allocation4], 0 }
   0x4   :  { %17 = vsyncpa [#allocation4 + $0x1], 0  ;;  %s3305_s30 = smov 0   ;;  %s3307_s10 = smov 0  }
   0x5   :  { %s3309_s11 = smov 0   ;;  %s3311_s12 = smov 0  }
   0x6 LB: > { %s3326_s13 = sadd.s32 4294967295, %s3245_s12   ;;  %s2434_s14 = sadd.s32 4294967294, %s3245_s12   ;;  %s3245_s12 = sphi %s3311_s12, %s4298_s12   ;;  %s3241_s11 = sphi %s3309_s11, %s4297_s11   ;;  %s3237_s10 = sphi %s3307_s10, %s4296_s10   ;;  %s3233_s30 = sphi %s3305_s30, %s4295_s30  }
   0x7   : > { %s3330_s15 = sadd.s32 1, %s3245_s12   ;;  %s224_s16 = sadd.s32 1, %s3241_s11 }
   0x8   : > { %s221_s17 = ssub.s32 %s3245_s12, %s3330_s15  ;;  %p234_p0 = scmp.ne.s32.totalorder %s3241_s11, %s3237_s10 }
   0x9   : > { %p222_p1 = scmp.eq.s32.totalorder %s221_s17, 0  ;;  %p235_p2 = scmp.eq.s32.totalorder %s3326_s13, 1 }
   0xa   : > { %p240_p3 = scmp.ne.s32.totalorder %s3237_s10, %s3233_s30  ;;  %p241_p4 = scmp.eq.s32.totalorder %s2434_s14, 1 }
   0xb   : > { %s3341_s18 = scalar_select %p222_p1, %s3241_s11, %s224_s16  }
   0xc   : > { %p3343_p5 = por %p235_p2, %p234_p0  ;;  %p3347_p6 = por %p241_p4, %p240_p3 }
   0xd   : > { %p2435_p7 = scmp.ge.s32.totalorder %s3245_s12, 1  ;;  %p248_p8 = scmp.lt.s32.totalorder %s3245_s12, 3 }
   0xe   : > { %s4239_s19 = scalar_select %p3343_p5, 1, 0 }
   0xf   : > { %s4240_s20 = scalar_select %p3347_p6, 1, 0 }
  0x10   : > { %p4212_p9 = scmp.eq.s32.totalorder %s3326_s13, 0  ;;  %p3354_p10 = pnand %p2435_p7, %p248_p8 }
  0x11   : > { %s3247_s22 = smov [#allocation2]   ;;  %s3151_s27 = scalar_lea.hbm %s4204_s2, 19200 }
  0x12   : > { %s4241_s21 = scalar_select %p3354_p10, 1, 0 }
  0x13   : > { %s263_s23 = sshll.u32 %s3247_s22, 4  ;;  %p3101_p11 = pneg %p3354_p10  ;;  %s264_s23 = int_to_ptr.vmem [resolvable:$true] %s263_s23 }
  0x14   : > { %p3152_p13 = scmp.ne.s32.totalorder %s4204_s2, %s3151_s27  ;;  %p3158_p3 = scmp.lt.u32.totalorder %s3151_s27, %s4204_s2 }
  0x15   : > { %p3362_p12 = pnand %p4212_p9, %p3101_p11 }
  0x17   : > { %p3153_p0 = pneg %p3362_p12 }
  0x19   : > { %p3154_p1 = pnand %p3153_p0, %p3152_p13 }
  0x1b   : > { %p3155_p2 = pneg %p3154_p1 }
  0x1d   : > { %p3160_p4 = pnand %p3158_p3, %p3155_p2 }
  0x1f   : > { %3163 = shalt.err (!%p3160_p4)
}
  0x20   : > { %s3164_s17 = scalar_lea.vmem %s264_s23, 19200  ;;  %p3172_p9 = scmp.lt.s32.totalorder %s264_s23, %s264_s23 }
  0x21   : > { %p3165_p7 = scmp.ne.s32.totalorder %s264_s23, %s3164_s17  ;;  %p3173_p6 = scmp.lt.s32.totalorder %s3164_s17, %s3164_s17 }
  0x23   : > { %p3167_p8 = pnand %p3165_p7, %p3153_p0  ;;  %p3174_p5 = por %p3173_p6, %p3172_p9 }
  0x25   : > { %p3168_p11 = pneg %p3167_p8 }
  0x27   : > { %p3175_p10 = pnand %p3174_p5, %p3168_p11 }
  0x29   : > { %3178 = shalt.err (!%p3175_p10)
}
  0x2a   : > { %s3248_s22 = smov 1280   ;;  %s3249_s25 = smov 80  }
  0x2b   : > { %3104 = dma.hbm_to_vmem [thread:$0]  (!%p3362_p12), %s4204_s2, 19200, %s264_s23, [#allocation3], %s3248_s22, %s3248_s22, %s3249_s25  }
  0x2c   : > { %p4243_p13 = scmp.ne.s32.totalorder %s4241_s21, 0 }
  0x2e   : > { %305 = sbr.rel (%p4243_p13) target bundleno = 1211 (0x4bb), region = 56 }
  0x35   : > { %p4244_p1 = scmp.eq.s32.totalorder %s3326_s13, 0 }
  0x37   : > { %3224 = dma.done.wait (%p4244_p1), [#allocation3], 19200   ;;  %p4245_p0 = pmov %p4244_p1 }
  0x38   : > { %v4215_v0 = vmov 0.0   ;;  %p340_p5 = scmp.lt.s32.totalorder %s3326_s13, 1  ;;  %vm402_vm0 = vcmask 1043456   ;;  %v350_v1 = vld [vmem:[%s4203_s1 + $0x8] sm:$0xff]  ;;  %v360_v2 = vld [vmem:[%s4203_s1 + $0x58] sm:$0xff]  ;;  %v349_v3 = vld [vmem:[%s4203_s1] sm:$0xff] }
  0x39   : > { %3226 = vsyncadd (%p4245_p0), [#allocation3], 4294948096  ;;  %497 = vmatprep.mubr.f32.mxu0 %v4215_v0  ;;  %509 = vmatprep.mubr.f32.mxu1 %v4215_v0  ;;  %v2685_v4 = vpack.c.bf16 %v360_v2, %v350_v1  ;;  %v359_v5 = vld [vmem:[%s4203_s1 + $0x50] sm:$0xff]  ;;  %v370_v6 = vld [vmem:[%s4203_s1 + $0xa8] sm:$0xff]  ;;  %vm3251_vm1 = vmmov 1   ;;  %s4248_s0 = sld [smem:[#allocation29_spill]] }
  0x3a   : > { %s3392_s24 = scalar_select %p340_p5, %s3326_s13, 1  ;;  %v380_v7 = vld [vmem:[%s4203_s1 + $0xf8] sm:$0xf]  ;;  %v2687_v8 = vpack.c.bf16 %v359_v5, %v349_v3  ;;  %vm3412_vm2 = vmpackc.low %vm402_vm0, %vm3251_vm1  ;;  %v369_v11 = vld [vmem:[%s4203_s1 + $0xa0] sm:$0xff]  ;;  %vm389_vm3 = vcmask 228352   ;;  %vm1137_vm4 = vcmask 982016  }
  0x3b   : > { %v2689_v9 = vpack.c.bf16 %v380_v7, %v370_v6  ;;  %v379_v12 = vld [vmem:[%s4203_s1 + $0xf0] sm:$0xf]  ;;  %2686 = vmatprep.subr.bf16.mxu0 %v2685_v4  ;;  %3084 = vmatprep.subr.bf16.mxu1 %v2685_v4  ;;  %v352_v13 = vld [vmem:[%s4203_s1 + $0x18] sm:$0xff]  ;;  %v362_v14 = vld [vmem:[%s4203_s1 + $0x68] sm:$0xff]  ;;  %vm3253_vm5 = vmmov 0   ;;  %vm1935_vm6 = vcmask 654336  }
  0x3c   : > { %s2523_s16 = sshll.u32 %s3392_s24, 5  ;;  %2688 = vmatpush1.bf16.msra.mxu0 %v2687_v8  ;;  %3086 = vmatpush1.bf16.msra.mxu1 %v2687_v8  ;;  %v2692_v15 = vpack.c.bf16 %v379_v12, %v369_v11  ;;  %v354_v16 = vld [vmem:[%s4203_s1 + $0x28] sm:$0xff]  ;;  %v364_v17 = vld [vmem:[%s4203_s1 + $0x78] sm:$0xff]  ;;  %v351_v18 = vld [vmem:[%s4203_s1 + $0x10] sm:$0xff]  ;;  %v2695_v19 = vpack.c.bf16 %v362_v14, %v352_v13  ;;  %vm2277_vm7 = vcmask 1041408   ;;  %vm2273_vm8 = vcmask 408576  }
  0x3d   : > { %2691 = vmatprep.subr.msk.bf16.mxu0 %vm3412_vm2, %v2689_v9  ;;  %3085 = vmatprep.subr.msk.bf16.mxu1 %vm3412_vm2, %v2689_v9  ;;  %v2705_v20 = vpack.c.bf16 %v364_v17, %v354_v16  ;;  %v361_v21 = vld [vmem:[%s4203_s1 + $0x60] sm:$0xff]  ;;  %v363_v23 = vld [vmem:[%s4203_s1 + $0x70] sm:$0xff]  ;;  %v372_v24 = vld [vmem:[%s4203_s1 + $0xb8] sm:$0xff]  ;;  %s338_s25 = sand.u32 1, %s3237_s10   ;;  %vm2352_vm9 = vcmask 73728   ;;  %p4293_p9 = scmp.ne.s32.totalorder %s4239_s19, 0 }
  0x3e   : > { %v353_v22 = vld [vmem:[%s4203_s1 + $0x20] sm:$0xff]  ;;  %v382_v25 = vld [vmem:[%s4203_s1 + $0x108] sm:$0xf]  ;;  %v384_v27 = vld [vmem:[%s4203_s1 + $0x118] sm:$0xf]  ;;  %v2697_v30 = vpack.c.bf16 %v361_v21, %v351_v18  ;;  %s339_s21 = scalar_lea.vmem [#allocation5], %s338_s25 }
  0x3f   : > { %s3445_s22 = scalar_lea.vmem %s4248_s0, %s2523_s16  ;;  %v374_v26 = vld [vmem:[%s4203_s1 + $0xc8] sm:$0xff]  ;;  %v2707_v31 = vpack.c.bf16 %v363_v23, %v353_v22  ;;  %v371_v32 = vld [vmem:[%s4203_s1 + $0xb0] sm:$0xff]  ;;  %v381_v33 = vld [vmem:[%s4203_s1 + $0x100] sm:$0xf]  ;;  %v2699_v36 = vpack.c.bf16 %v382_v25, %v372_v24  ;;  %s2520_s0 = sshll.u32 %s3326_s13, 4 }
  0x40   : > { %2694 = vmatpush1.bf16.msk.msra.mxu0 %vm3412_vm2, %v2692_v15  ;;  %3087 = vmatpush1.bf16.msk.msra.mxu1 %vm3412_vm2, %v2692_v15  ;;  %v3473_v28 = vld [vmem:[%s3445_s22] sm:$0xff]  ;;  %v3476_v29 = vld [vmem:[%s3445_s22 + $0x10] sm:$0xff]  ;;  %v2709_v37 = vpack.c.bf16 %v384_v27, %v374_v26  ;;  %v358_v38 = vld [vmem:[%s4203_s1 + $0x48] sm:$0xff]  ;;  %v2702_v44 = vpack.c.bf16 %v381_v33, %v371_v32  ;;  %s2367_s23 = sshll.u32 %s339_s21, 4  ;;  %s4160_s29 = scalar_lea.hbm %s4211_s9, %s2520_s0  ;;  %s4162_s23 = int_to_ptr.vmem [resolvable:$true] %s2367_s23 }
  0x41   : > { %2696 = vmatprep.subr.bf16.mxu1 %v2695_v19  ;;  %2706 = vmatprep.subr.bf16.mxu0 %v2705_v20  ;;  %v373_v34 = vld [vmem:[%s4203_s1 + $0xc0] sm:$0xff]  ;;  %v383_v35 = vld [vmem:[%s4203_s1 + $0x110] sm:$0xf]  ;;  %v368_v39 = vld [vmem:[%s4203_s1 + $0x98] sm:$0xff]  ;;  %s2355_s16 = scalar_lea.sflag [#allocation4], %s338_s25  ;;  %s3179_s14 = scalar_lea.vmem %s4162_s23, 16 }
  0x42   : > { %v356_v40 = vld [vmem:[%s4203_s1 + $0x38] sm:$0xff]  ;;  %v366_v41 = vld [vmem:[%s4203_s1 + $0x88] sm:$0xff]  ;;  %v2712_v45 = vpack.c.bf16 %v383_v35, %v373_v34  ;;  %v357_v46 = vld [vmem:[%s4203_s1 + $0x40] sm:$0xff]  ;;  %v2725_v50 = vpack.c.bf16 %v368_v39, %v358_v38  ;;  %p3180_p6 = scmp.ne.s32.totalorder %s4162_s23, %s3179_s14  ;;  %s3254_s13 = smov [#allocation5]  }
  0x43   : > { %2444 = vmatmul.mubr.msk.f32.vlgmr.msra.gmra.mrb[0].mxu0 %vm389_vm3, %v3473_v28  ;;  %2446 = vmatmul.mubr.msk.f32.vlgmr.msra.gmra.mrb[0].mxu1 %vm389_vm3, %v3476_v29  ;;  %v3507_v42 = vld [vmem:[%s3445_s22 + $0x8] sm:$0xff]  ;;  %v3510_v43 = vld [vmem:[%s3445_s22 + $0x18] sm:$0xff]  ;;  %v367_v47 = vld [vmem:[%s4203_s1 + $0x90] sm:$0xff]  ;;  %v2715_v51 = vpack.c.bf16 %v366_v41, %v356_v40  ;;  %s3183_s17 = sshll.u32 %s3254_s13, 4  ;;  %s3184_s17 = int_to_ptr.vmem [resolvable:$false] %s3183_s17 }
  0x44   : > { %2698 = vmatpush1.bf16.msra.mxu1 %v2697_v30  ;;  %2708 = vmatpush1.bf16.msra.mxu0 %v2707_v31  ;;  %v355_v48 = vld [vmem:[%s4203_s1 + $0x30] sm:$0xff]  ;;  %v365_v49 = vld [vmem:[%s4203_s1 + $0x80] sm:$0xff]  ;;  %v378_v52 = vld [vmem:[%s4203_s1 + $0xe8] sm:$0xff]  ;;  %v2727_v56 = vpack.c.bf16 %v367_v47, %v357_v46  ;;  %p3181_p10 = pnand %p3180_p6, %p4293_p9  ;;  %s3185_s22 = scalar_lea.vmem %s3184_s17, 32 }
  0x45   : > { %503 = vmatprep.mubr.f32.mxu0 %v4215_v0  ;;  %515 = vmatprep.mubr.f32.mxu1 %v4215_v0  ;;  %v388_v53 = vld [vmem:[%s4203_s1 + $0x138] sm:$0xf]  ;;  %v386_v55 = vld [vmem:[%s4203_s1 + $0x128] sm:$0xf]  ;;  %v2717_v57 = vpack.c.bf16 %v365_v49, %v355_v48  ;;  %v377_v58 = vld [vmem:[%s4203_s1 + $0xe0] sm:$0xff]  ;;  %p3186_p2 = scmp.lt.s32.totalorder %s4162_s23, %s3184_s17  ;;  %p3187_p3 = scmp.lt.s32.totalorder %s3185_s22, %s3179_s14 }
  0x46   : > { %2701 = vmatprep.subr.msk.bf16.mxu1 %vm3412_vm2, %v2699_v36  ;;  %2711 = vmatprep.subr.msk.bf16.mxu0 %vm3412_vm2, %v2709_v37  ;;  %v376_v54 = vld [vmem:[%s4203_s1 + $0xd8] sm:$0xff]  ;;  %v2729_v59 = vpack.c.bf16 %v388_v53, %v378_v52  ;;  %v387_v61 = vld [vmem:[%s4203_s1 + $0x130] sm:$0xf]  ;;  %v385_v63 = vld [vmem:[%s4203_s1 + $0x120] sm:$0xf]  ;;  %p3182_p12 = pneg %p3181_p10 }
  0x47   : > { %2445 = vmatmul.mubr.msk.f32.gmra.mrb[2].mxu0 %vm389_vm3, %v3507_v42  ;;  %2447 = vmatmul.mubr.msk.f32.gmra.mrb[2].mxu1 %vm389_vm3, %v3510_v43  ;;  %v2719_v60 = vpack.c.bf16 %v386_v55, %v376_v54  ;;  %v375_v62 = vld [vmem:[%s4203_s1 + $0xd0] sm:$0xff]  ;;  %v2732_v1 = vpack.c.bf16 %v387_v61, %v377_v58  ;;  %v998_v4 = vld [vmem:[#allocation2 + $0x58] sm:$0xff]  ;;  %v987_v8 = vld [vmem:[#allocation2] sm:$0xff]  ;;  %p3188_p4 = por %p3187_p3, %p3186_p2 }
  0x48   : > { %2704 = vmatpush1.bf16.msk.msra.mxu1 %vm3412_vm2, %v2702_v44  ;;  %2714 = vmatpush1.bf16.msk.msra.mxu0 %vm3412_vm2, %v2712_v45  ;;  %v2722_v2 = vpack.c.bf16 %v385_v63, %v375_v62  ;;  %v988_v3 = vld [vmem:[#allocation2 + $0x8] sm:$0xff]  ;;  %v1002_v7 = vld [vmem:[#allocation2 + $0x78] sm:$0xff]  ;;  %v997_v9 = vld [vmem:[#allocation2 + $0x50] sm:$0xff] }
  0x49   : > { %586 = vmatprep.mubr.f32.mxu1 %v4215_v0  ;;  %675 = vmatprep.mubr.f32.mxu0 %v4215_v0  ;;  %v992_v5 = vld [vmem:[#allocation2 + $0x28] sm:$0xff]  ;;  %v3620_v6 = vpack.c.bf16 %v998_v4, %v988_v3  ;;  %v3624_v11 = vpack.c.bf16 %v997_v9, %v987_v8  ;;  %v991_v12 = vld [vmem:[#allocation2 + $0x20] sm:$0xff]  ;;  %v1001_v13 = vld [vmem:[#allocation2 + $0x70] sm:$0xff]  ;;  %p3189_p7 = pnand %p3188_p4, %p3182_p12 }
  0x4a   : > { %2726 = vmatprep.subr.bf16.mxu0 %v2725_v50  ;;  %2716 = vmatprep.subr.bf16.mxu1 %v2715_v51  ;;  %v3622_v10 = vpack.c.bf16 %v1002_v7, %v992_v5  ;;  %v3627_v14 = vpack.c.bf16 %v1001_v13, %v991_v12  ;;  %v1008_v15 = vld [vmem:[#allocation2 + $0xa8] sm:$0xff]  ;;  %v1018_v16 = vld [vmem:[#allocation2 + $0xf8] sm:$0xff]  ;;  %v1007_v20 = vld [vmem:[#allocation2 + $0xa0] sm:$0xff] }
  0x4b   : > { %2450 = vmatmul.mubr.msk.f32.vlgmr.msra.gmra.mrb[4].mxu1 %vm389_vm3, %v3473_v28  ;;  %2456 = vmatmul.mubr.msk.f32.vlgmr.msra.gmra.mrb[4].mxu0 %vm389_vm3, %v3473_v28  ;;  %v1012_v17 = vld [vmem:[#allocation2 + $0xc8] sm:$0xff]  ;;  %v3632_v18 = vpack.c.bf16 %v1018_v16, %v1008_v15  ;;  %v1022_v19 = vld [vmem:[#allocation2 + $0x118] sm:$0xff]  ;;  %v1017_v21 = vld [vmem:[#allocation2 + $0xf0] sm:$0xff] }
  0x4c   : > { %2728 = vmatpush1.bf16.msra.mxu0 %v2727_v56  ;;  %2718 = vmatpush1.bf16.msra.mxu1 %v2717_v57  ;;  %v3634_v22 = vpack.c.bf16 %v1022_v19, %v1012_v17  ;;  %v3636_v23 = vpack.c.bf16 %v1017_v21, %v1007_v20  ;;  %v1011_v24 = vld [vmem:[#allocation2 + $0xc0] sm:$0xff]  ;;  %v1021_v25 = vld [vmem:[#allocation2 + $0x110] sm:$0xff]  ;;  %v1028_v27 = vld [vmem:[#allocation2 + $0x148] sm:$0xff] }
  0x4d   : > { %592 = vmatprep.mubr.f32.mxu1 %v4215_v0  ;;  %681 = vmatprep.mubr.f32.mxu0 %v4215_v0  ;;  %v3639_v26 = vpack.c.bf16 %v1021_v25, %v1011_v24  ;;  %v1042_v31 = vld [vmem:[#allocation2 + $0x1b8] sm:$0xff]  ;;  %v1027_v32 = vld [vmem:[#allocation2 + $0x140] sm:$0xff]  ;;  %v1037_v33 = vld [vmem:[#allocation2 + $0x190] sm:$0xff] }
  0x4e   : > { %2731 = vmatprep.subr.msk.bf16.mxu0 %vm3412_vm2, %v2729_v59  ;;  %2721 = vmatprep.subr.msk.bf16.mxu1 %vm3412_vm2, %v2719_v60  ;;  %v3648_v35 = vpack.c.bf16 %v1037_v33, %v1027_v32  ;;  %v1031_v36 = vld [vmem:[#allocation2 + $0x160] sm:$0xff]  ;;  %v1041_v37 = vld [vmem:[#allocation2 + $0x1b0] sm:$0xff]  ;;  %v1048_v39 = vld [vmem:[#allocation2 + $0x1e8] sm:$0xff] }
  0x4f   : > { %2451 = vmatmul.mubr.msk.f32.gmra.mrb[6].mxu1 %vm389_vm3, %v3507_v42  ;;  %2457 = vmatmul.mubr.msk.f32.gmra.mrb[6].mxu0 %vm389_vm3, %v3507_v42  ;;  %v3651_v38 = vpack.c.bf16 %v1041_v37, %v1031_v36  ;;  %v1058_v40 = vld [vmem:[#allocation2 + $0x238] sm:$0xff]  ;;  %v1052_v41 = vld [vmem:[#allocation2 + $0x208] sm:$0xff]  ;;  %v1047_v44 = vld [vmem:[#allocation2 + $0x1e0] sm:$0xff] }
  0x50   : > { %598 = vmatprep.mubr.f32.mxu1 %v4215_v0  ;;  %687 = vmatprep.mubr.f32.mxu0 %v4215_v0  ;;  %v1057_v45 = vld [vmem:[#allocation2 + $0x230] sm:$0xff]  ;;  %v1051_v48 = vld [vmem:[#allocation2 + $0x200] sm:$0xff]  ;;  %v1068_v51 = vld [vmem:[#allocation2 + $0x288] sm:$0xff] }
  0x51   : > { %2734 = vmatpush1.bf16.msk.msra.mxu0 %vm3412_vm2, %v2732_v1  ;;  %2724 = vmatpush1.bf16.msk.msra.mxu1 %vm3412_vm2, %v2722_v2  ;;  %v3660_v47 = vpack.c.bf16 %v1057_v45, %v1047_v44  ;;  %v1061_v49 = vld [vmem:[#allocation2 + $0x250] sm:$0xff]  ;;  %v1078_v52 = vld [vmem:[#allocation2 + $0x2d8] sm:$0xff]  ;;  %v1072_v53 = vld [vmem:[#allocation2 + $0x2a8] sm:$0xff] }
  0x52   : > { %2736 = vmatprep.subr.bf16.mxu0 %v3620_v6  ;;  %2792 = vmatprep.subr.bf16.mxu1 %v3622_v10  ;;  %v3663_v50 = vpack.c.bf16 %v1061_v49, %v1051_v48  ;;  %v3668_v54 = vpack.c.bf16 %v1078_v52, %v1068_v51  ;;  %v1082_v55 = vld [vmem:[#allocation2 + $0x2f8] sm:$0xff]  ;;  %v1067_v56 = vld [vmem:[#allocation2 + $0x280] sm:$0xff]  ;;  %v1077_v57 = vld [vmem:[#allocation2 + $0x2d0] sm:$0xff] }
  0x53   : > { %2452 = vmatmul.mubr.msk.f32.gmra.mrb[8].mxu1 %vm389_vm3, %v3476_v29  ;;  %2458 = vmatmul.mubr.msk.f32.gmra.mrb[8].mxu0 %vm389_vm3, %v3476_v29  ;;  %v3670_v58 = vpack.c.bf16 %v1082_v55, %v1072_v53  ;;  %v3672_v59 = vpack.c.bf16 %v1077_v57, %v1067_v56  ;;  %v1071_v60 = vld [vmem:[#allocation2 + $0x2a0] sm:$0xff]  ;;  %v1081_v61 = vld [vmem:[#allocation2 + $0x2f0] sm:$0xff]  ;;  %v1088_v63 = vld [vmem:[#allocation2 + $0x328] sm:$0xff] }
  0x54   : > { %604 = vmatprep.mubr.f32.mxu1 %v4215_v0  ;;  %693 = vmatprep.mubr.f32.mxu0 %v4215_v0  ;;  %v3675_v62 = vpack.c.bf16 %v1081_v61, %v1071_v60  ;;  %v1098_v1 = vld [vmem:[#allocation2 + $0x378] sm:$0xff]  ;;  %v1092_v2 = vld [vmem:[#allocation2 + $0x348] sm:$0xff]  ;;  %v1087_v5 = vld [vmem:[#allocation2 + $0x320] sm:$0xff] }
  0x55   : > { %v3680_v3 = vpack.c.bf16 %v1098_v1, %v1088_v63  ;;  %v1102_v4 = vld [vmem:[#allocation2 + $0x398] sm:$0xff]  ;;  %v1097_v7 = vld [vmem:[#allocation2 + $0x370] sm:$0xff]  ;;  %v1091_v12 = vld [vmem:[#allocation2 + $0x340] sm:$0xff] }
  0x56   : > { %v3682_v8 = vpack.c.bf16 %v1102_v4, %v1092_v2  ;;  %v3684_v9 = vpack.c.bf16 %v1097_v7, %v1087_v5  ;;  %v1101_v13 = vld [vmem:[#allocation2 + $0x390] sm:$0xff]  ;;  %v1108_v16 = vld [vmem:[#allocation2 + $0x3c8] sm:$0xff]  ;;  %v1118_v17 = vld [vmem:[#allocation2 + $0x418] sm:$0xff] }
  0x57   : > { %2453 = vmatmul.mubr.msk.f32.gmra.mrb[10].mxu1 %vm389_vm3, %v3510_v43  ;;  %2459 = vmatmul.mubr.msk.f32.gmra.mrb[10].mxu0 %vm389_vm3, %v3510_v43  ;;  %v3687_v15 = vpack.c.bf16 %v1101_v13, %v1091_v12  ;;  %v1112_v19 = vld [vmem:[#allocation2 + $0x3e8] sm:$0xff]  ;;  %v3692_v20 = vpack.c.bf16 %v1118_v17, %v1108_v16  ;;  %v1122_v21 = vld [vmem:[#allocation2 + $0x438] sm:$0xff]  ;;  %v1107_v24 = vld [vmem:[#allocation2 + $0x3c0] sm:$0xff] }
  0x58   : > { %764 = vmatprep.mubr.f32.mxu1 %v4215_v0  ;;  %853 = vmatprep.mubr.f32.mxu0 %v4215_v0  ;;  %v1117_v25 = vld [vmem:[#allocation2 + $0x410] sm:$0xff]  ;;  %v3704_v33 = vld [vmem:[#allocation2 + $0x468] sm:$0xff]  ;;  %v990_v37 = vld [vmem:[#allocation2 + $0x18] sm:$0xff] }
  0x59   : > { %4249 = vst [vmem:[#allocation8_spill] sm:$0xff] %v3687_v15  ;;  %v3706_v36 = vld [vmem:[#allocation2 + $0x488] sm:$0xff]  ;;  %v1006_v45 = vld [vmem:[#allocation2 + $0x98] sm:$0xff] }
  0x5a   : > { %4252 = vst [vmem:[#allocation11_spill] sm:$0xff] %v3706_v36  ;;  %v996_v44 = vld [vmem:[#allocation2 + $0x48] sm:$0xff] }
  0x5b   : > { %2462 = vmatmul.mubr.msk.f32.vlgmr.msra.gmra.mrb[12].mxu1 %vm389_vm3, %v3473_v28  ;;  %2468 = vmatmul.mubr.msk.f32.vlgmr.msra.gmra.mrb[12].mxu0 %vm389_vm3, %v3473_v28  ;;  %v1038_v28 = vld [vmem:[#allocation2 + $0x198] sm:$0xff]  ;;  %v3718_v48 = vpack.c.bf16 %v1006_v45, %v996_v44 }
  0x5c   : > { %770 = vmatprep.mubr.f32.mxu1 %v4215_v0  ;;  %859 = vmatprep.mubr.f32.mxu0 %v4215_v0  ;;  %v3644_v30 = vpack.c.bf16 %v1038_v28, %v1028_v27  ;;  %v3694_v27 = vpack.c.bf16 %v1122_v21, %v1112_v19  ;;  %v3696_v28 = vpack.c.bf16 %v1117_v25, %v1107_v24 }
  0x5d   : > { %2738 = vmatpush1.bf16.msra.mxu0 %v3624_v11  ;;  %2794 = vmatpush1.bf16.msra.mxu1 %v3627_v14  ;;  %4254 = vst [vmem:[#allocation13_spill] sm:$0xff] %v3718_v48 }
  0x5e   : > { %2740 = vmatprep.subr.bf16.mxu0 %v3632_v18  ;;  %2796 = vmatprep.subr.bf16.mxu1 %v3634_v22  ;;  %4250 = vst [vmem:[#allocation9_spill] sm:$0xff] %v3694_v27 }
  0x5f   : > { %2463 = vmatmul.mubr.msk.f32.gmra.mrb[14].mxu1 %vm389_vm3, %v3507_v42  ;;  %2469 = vmatmul.mubr.msk.f32.gmra.mrb[14].mxu0 %vm389_vm3, %v3507_v42  ;;  %v3656_v42 = vpack.c.bf16 %v1058_v40, %v1048_v39  ;;  %v3710_v39 = vld [vmem:[#allocation2 + $0x460] sm:$0xff] }
  0x60   : > { %776 = vmatprep.mubr.f32.mxu1 %v4215_v0  ;;  %865 = vmatprep.mubr.f32.mxu0 %v4215_v0  ;;  %v3712_v40 = vld [vmem:[#allocation2 + $0x480] sm:$0xff] }
  0x61   : > { %2742 = vmatpush1.bf16.msra.mxu0 %v3636_v23  ;;  %2798 = vmatpush1.bf16.msra.mxu1 %v3639_v26  ;;  %4253 = vst [vmem:[#allocation12_spill] sm:$0xff] %v3712_v40 }
  0x62   : > { %2744 = vmatprep.subr.bf16.mxu0 %v3644_v30 }
  0x63   : > { %2464 = vmatmul.mubr.msk.f32.gmra.mrb[16].mxu1 %vm389_vm3, %v3476_v29  ;;  %2470 = vmatmul.mubr.msk.f32.gmra.mrb[16].mxu0 %vm389_vm3, %v3476_v29  ;;  %v1032_v29 = vld [vmem:[#allocation2 + $0x168] sm:$0xff] }
  0x64   : > { %782 = vmatprep.mubr.f32.mxu1 %v4215_v0  ;;  %871 = vmatprep.mubr.f32.mxu0 %v4215_v0  ;;  %v3646_v34 = vpack.c.bf16 %v1042_v31, %v1032_v29  ;;  %v1111_v29 = vld [vmem:[#allocation2 + $0x3e0] sm:$0xff]  ;;  %v1121_v31 = vld [vmem:[#allocation2 + $0x430] sm:$0xff] }
  0x65   : > { %2746 = vmatpush1.bf16.msra.mxu0 %v3648_v35  ;;  %v3699_v32 = vpack.c.bf16 %v1121_v31, %v1111_v29 }
  0x66   : > { %2800 = vmatprep.subr.bf16.mxu1 %v3646_v34  ;;  %2748 = vmatprep.subr.bf16.mxu0 %v3656_v42 }
  0x67   : > { %2465 = vmatmul.mubr.msk.f32.gmra.mrb[18].mxu1 %vm389_vm3, %v3510_v43  ;;  %2471 = vmatmul.mubr.msk.f32.gmra.mrb[18].mxu0 %vm389_vm3, %v3510_v43  ;;  %v1062_v43 = vld [vmem:[#allocation2 + $0x258] sm:$0xff]  ;;  %4251 = vst [vmem:[#allocation10_spill] sm:$0xff] %v3699_v32 }
  0x68   : > { %1205 = vmatprep.mubr.f32.mxu0 %v4215_v0  ;;  %1347 = vmatprep.mubr.f32.mxu1 %v4215_v0  ;;  %v3658_v46 = vpack.c.bf16 %v1062_v43, %v1052_v41  ;;  %v1000_v41 = vld [vmem:[#allocation2 + $0x68] sm:$0xff] }
  0x69   : > { %2802 = vmatpush1.bf16.msra.mxu1 %v3651_v38  ;;  %2750 = vmatpush1.bf16.msra.mxu0 %v3660_v47  ;;  %v3715_v43 = vpack.c.bf16 %v1000_v41, %v990_v37 }
  0x6a   : > { %2804 = vmatprep.subr.bf16.mxu1 %v3658_v46  ;;  %2752 = vmatprep.subr.bf16.mxu0 %v3668_v54 }
  0x6d   : > { %2806 = vmatpush1.bf16.msra.mxu1 %v3663_v50  ;;  %2754 = vmatpush1.bf16.msra.mxu0 %v3672_v59 }
  0x6e   : > { %2808 = vmatprep.subr.bf16.mxu1 %v3670_v58  ;;  %2756 = vmatprep.subr.bf16.mxu0 %v3680_v3 }
  0x71   : > { %2810 = vmatpush1.bf16.msra.mxu1 %v3675_v62  ;;  %2758 = vmatpush1.bf16.msra.mxu0 %v3684_v9 }
  0x72   : > { %2812 = vmatprep.subr.bf16.mxu1 %v3682_v8  ;;  %2760 = vmatprep.subr.bf16.mxu0 %v3692_v20 }
  0x75   : > { %2814 = vmatpush1.bf16.msra.mxu1 %v3687_v15  ;;  %2762 = vmatpush1.bf16.msra.mxu0 %v3696_v28  ;;  %v1123_v15 = vld [vmem:[#allocation2 + $0x440] sm:$0xff] }
  0x76   : > { %2816 = vmatprep.subr.bf16.mxu1 %v3694_v27  ;;  %1169 = vmatprep.subr.mxu0 %v3704_v33 }
  0x79   : > { %2818 = vmatpush1.bf16.msra.mxu1 %v3699_v32  ;;  %1170 = vmatpush1.msra.mxu0 %v3710_v39 }
  0x7a   : > { %1311 = vmatprep.subr.mxu1 %v3706_v36  ;;  %2764 = vmatprep.subr.bf16.mxu0 %v3715_v43 }
  0x7d   : > { %1312 = vmatpush1.msra.mxu1 %v3712_v40 }
  0x7e   : > { %2848 = vmatprep.subr.bf16.mxu1 %v3718_v48 }
 0x116   : > { %v499_v49 = vpop.f32.mrb[0].mxu0  ;;  %v511_v51 = vpop.f32.mrb[0].mxu1 }
 0x117   : > { %v501_v52 = vpop.f32.mrb[1].mxu0  ;;  %v513_v53 = vpop.f32.mrb[1].mxu1 }
 0x118   : > { %v952_v55 = vrot.slane %v501_v52, 1 }
 0x11a   : > { %v505_v56 = vpop.f32.mrb[2].mxu0  ;;  %v517_v57 = vpop.f32.mrb[2].mxu1 }
 0x11b   : > { %v894_v60 = vadd.f32 %v513_v53, %v505_v56  ;;  %v954_v61 = vadd.f32 %v952_v55, %v517_v57  ;;  %v507_v63 = vpop.f32.mrb[3].mxu0  ;;  %v519_v1 = vpop.f32.mrb[3].mxu1 }
 0x11c   : > { %v879_v2 = vadd.f32 %v507_v63, %v499_v49  ;;  %v924_v4 = vadd.f32 %v519_v1, %v511_v51 }
 0x11e   : > { %v588_v5 = vpop.f32.mrb[4].mxu1  ;;  %v677_v7 = vpop.f32.mrb[4].mxu0 }
 0x11f   : > { %v926_v12 = vrot.slane %v588_v5, 1  ;;  %v679_v13 = vpop.f32.mrb[5].mxu0  ;;  %v590_v16 = vpop.f32.mrb[5].mxu1 }
 0x121   : > { %v928_v17 = vadd.f32 %v926_v12, %v924_v4  ;;  %v897_v4 = vrot.slane %v590_v16, 1 }
 0x122   : > { %v594_v19 = vpop.f32.mrb[6].mxu1  ;;  %v683_v21 = vpop.f32.mrb[6].mxu0 }
 0x123   : > { %v956_v24 = vrot.slane %v594_v19, 1  ;;  %v596_v25 = vpop.f32.mrb[7].mxu1  ;;  %v685_v29 = vpop.f32.mrb[7].mxu0 }
 0x124   : > { %v930_v31 = vrot.slane %v596_v25, 1  ;;  %v883_v25 = vrot.slane %v677_v7, 1 }
 0x125   : > { %v958_v37 = vadd.f32 %v956_v24, %v954_v61 }
 0x126   : > { %v932_v41 = vadd.f32 %v930_v31, %v928_v17  ;;  %v600_v44 = vpop.f32.mrb[8].mxu1  ;;  %v689_v45 = vpop.f32.mrb[8].mxu0  ;;  %v901_v17 = vrot.slane %v683_v21, 1 }
 0x127   : > { %v880_v52 = vadd.f32 %v879_v2, %v600_v44  ;;  %v934_v53 = vrot.slane %v689_v45, 1  ;;  %v602_v49 = vpop.f32.mrb[9].mxu1  ;;  %v691_v51 = vpop.f32.mrb[9].mxu0 }
 0x128   : > { %v960_v55 = vrot.slane %v602_v49, 1 }
 0x129   : > { %v3722_v56 = vadd.f32 %v934_v53, %v932_v41 }
 0x12a   : > { %v962_v57 = vadd.f32 %v960_v55, %v958_v37  ;;  %v606_v63 = vpop.f32.mrb[10].mxu1  ;;  %v695_v1 = vpop.f32.mrb[10].mxu0 }
 0x12b   : > { %v895_v5 = vadd.f32 %v894_v60, %v606_v63  ;;  %v964_v12 = vrot.slane %v695_v1, 1  ;;  %v608_v19 = vpop.f32.mrb[11].mxu1  ;;  %v697_v0 = vpop.f32.mrb[11].mxu0 }
 0x12c   : > { %v881_v61 = vadd.f32 %v880_v52, %v608_v19 }
 0x12d   : > { %v899_v24 = vadd.f32 %v897_v4, %v895_v5  ;;  %v966_v31 = vadd.f32 %v964_v12, %v962_v57 }
 0x12e   : > { %v885_v2 = vadd.f32 %v883_v25, %v881_v61  ;;  %v766_v44 = vpop.f32.mrb[12].mxu1  ;;  %v855_v45 = vpop.f32.mrb[12].mxu0 }
 0x12f   : > { %v903_v48 = vadd.f32 %v901_v17, %v899_v24  ;;  %v969_v49 = vrot.slane %v766_v44, 1  ;;  %v857_v41 = vpop.f32.mrb[13].mxu0  ;;  %v768_v53 = vpop.f32.mrb[13].mxu1 }
 0x130   : > { %v890_v17 = vrot.slane %v857_v41, 1  ;;  %v939_v24 = vrot.slane %v768_v53, 1 }
 0x131   : > { %v971_v37 = vadd.f32 %v969_v49, %v697_v0 }
 0x132   : > { %v772_v55 = vpop.f32.mrb[14].mxu1  ;;  %v861_v40 = vpop.f32.mrb[14].mxu0 }
 0x133   : > { %v886_v16 = vadd.f32 %v772_v55, %v679_v13  ;;  %v774_v60 = vpop.f32.mrb[15].mxu1  ;;  %v863_v63 = vpop.f32.mrb[15].mxu0  ;;  %v908_v55 = vrot.slane %v855_v45, 1  ;;  %v989_v45 = vld [vmem:[#allocation2 + $0x10] sm:$0xff] }
 0x134   : > { %v973_v1 = vrot.slane %v774_v60, 1 }
 0x136   : > { %v975_v36 = vadd.f32 %v973_v1, %v971_v37  ;;  %v778_v7 = vpop.f32.mrb[16].mxu1  ;;  %v867_v52 = vpop.f32.mrb[16].mxu0  ;;  %v943_v37 = vrot.slane %v861_v40, 1 }
 0x137   : > { %v905_v21 = vadd.f32 %v778_v7, %v685_v29  ;;  %v977_v4 = vrot.slane %v867_v52, 1  ;;  %v780_v57 = vpop.f32.mrb[17].mxu1  ;;  %v869_v5 = vpop.f32.mrb[17].mxu0  ;;  %v912_v29 = vrot.slane %v863_v63, 1  ;;  %v995_v63 = vld [vmem:[#allocation2 + $0x40] sm:$0xff] }
 0x138   : > { %v887_v12 = vadd.f32 %v886_v16, %v780_v57  ;;  %v947_v16 = vrot.slane %v869_v5, 1  ;;  %v1016_v5 = vld [vmem:[#allocation2 + $0xe8] sm:$0xff] }
 0x139   : > { %v979_v19 = vadd.f32 %v977_v4, %v975_v36 }
 0x13a   : > { %v784_v25 = vpop.f32.mrb[18].mxu1  ;;  %v873_v61 = vpop.f32.mrb[18].mxu0 }
 0x13b   : > { %v937_v0 = vadd.f32 %v784_v25, %v691_v51  ;;  %v888_v44 = vadd.f32 %v887_v12, %v873_v61  ;;  %v786_v49 = vpop.f32.mrb[19].mxu1  ;;  %v875_v13 = vpop.f32.mrb[19].mxu0  ;;  %v3729_v51 = vld [vmem:[%s4207_s5] ss:$0 sm:$0xff]  ;;  %v1020_v25 = vld [vmem:[#allocation2 + $0x108] sm:$0xff] }
 0x13c   : > { %v906_v32 = vadd.f32 %v905_v21, %v786_v49  ;;  %v981_v60 = vrot.slane %v875_v13, 1  ;;  %v999_v21 = vld [vmem:[#allocation2 + $0x60] sm:$0xff]  ;;  %v1026_v61 = vld [vmem:[#allocation2 + $0x138] sm:$0xff] }
 0x13d   : > { %v941_v1 = vadd.f32 %v939_v24, %v937_v0  ;;  %v892_v27 = vadd.f32 %v890_v17, %v888_v44  ;;  %v1009_v24 = vld [vmem:[#allocation2 + $0xb0] sm:$0xff]  ;;  %v1019_v0 = vld [vmem:[#allocation2 + $0x100] sm:$0xff]  ;;  %v3745_v13 = vpack.c.bf16 %v1026_v61, %v1016_v5 }
 0x13e   : > { %v910_v7 = vadd.f32 %v908_v55, %v906_v32  ;;  %v3724_v52 = vadd.f32 %v981_v60, %v979_v19  ;;  %v1005_v32 = vld [vmem:[#allocation2 + $0x90] sm:$0xff]  ;;  %v1010_v19 = vld [vmem:[#allocation2 + $0xb8] sm:$0xff]  ;;  %v1015_v55 = vld [vmem:[#allocation2 + $0xe0] sm:$0xff] }
 0x13f   : > { %v945_v36 = vadd.f32 %v943_v37, %v941_v1  ;;  %v893_v4 = vmax.f32 %v885_v2, %v892_v27  ;;  %v3737_v17 = vpack.c.bf16 %v1005_v32, %v995_v63  ;;  %v3743_v49 = vpack.c.bf16 %v1020_v25, %v1010_v19  ;;  %4256 = vst [vmem:[#allocation15_spill] sm:$0xff] %v3745_v13  ;;  %v1025_v60 = vld [vmem:[#allocation2 + $0x130] sm:$0xff]  ;;  %v1040_v37 = vld [vmem:[#allocation2 + $0x1a8] sm:$0xff]  ;;  %v1066_v63 = vld [vmem:[#allocation2 + $0x278] sm:$0xff] }
 0x140   : > { %v914_v57 = vadd.f32 %v912_v29, %v910_v7  ;;  %v1036_v1 = vld [vmem:[#allocation2 + $0x188] sm:$0xff]  ;;  %v1046_v29 = vld [vmem:[#allocation2 + $0x1d8] sm:$0xff]  ;;  %v3753_v7 = vpack.c.bf16 %v1019_v0, %v1009_v24  ;;  %v4259_v32 = vmov 0.0   ;;  %v1049_v5 = vld [vmem:[#allocation2 + $0x1f0] sm:$0xff] }
 0x141   : > { %v949_v41 = vadd.f32 %v947_v16, %v945_v36  ;;  %v904_v53 = vmax.f32 %v893_v4, %v903_v48  ;;  %v3735_v48 = vpack.c.bf16 %v999_v21, %v989_v45  ;;  %4255 = vst [vmem:[#allocation14_spill] sm:$0xff] %v3737_v17  ;;  %v3755_v16 = vpack.c.bf16 %v1025_v60, %v1015_v55  ;;  %v1029_v36 = vld [vmem:[#allocation2 + $0x150] sm:$0xff]  ;;  %v1039_v4 = vld [vmem:[#allocation2 + $0x1a0] sm:$0xff]  ;;  %v1050_v21 = vld [vmem:[#allocation2 + $0x1f8] sm:$0xff] }
 0x142   : > { %v1045_v45 = vld [vmem:[#allocation2 + $0x1d0] sm:$0xff]  ;;  %v3767_v19 = vpack.c.bf16 %v1039_v4, %v1029_v36  ;;  %v1059_v61 = vld [vmem:[#allocation2 + $0x240] sm:$0xff]  ;;  %v1070_v60 = vld [vmem:[#allocation2 + $0x298] sm:$0xff] }
 0x143   : > { %v915_v40 = vmax.f32 %v904_v53, %v914_v57  ;;  %v950_v12 = vmax.f32 %v3722_v56, %v949_v41  ;;  %4257 = vst [vmem:[#allocation16_spill] sm:$0xff] %v3755_v16  ;;  %v3761_v41 = vpack.c.bf16 %v1046_v29, %v1036_v1  ;;  %v1035_v53 = vld [vmem:[#allocation2 + $0x180] sm:$0xff]  ;;  %v1065_v55 = vld [vmem:[#allocation2 + $0x270] sm:$0xff]  ;;  %v1086_v1 = vld [vmem:[#allocation2 + $0x318] sm:$0xff]  ;;  %v3779_v29 = vpack.c.bf16 %v1059_v61, %v1049_v5 }
 0x144   : > { %v3769_v25 = vpack.c.bf16 %v1045_v45, %v1035_v53  ;;  %v1055_v0 = vld [vmem:[#allocation2 + $0x220] sm:$0xff]  ;;  %v1069_v4 = vld [vmem:[#allocation2 + $0x290] sm:$0xff]  ;;  %v1100_v56 = vld [vmem:[#allocation2 + $0x388] sm:$0xff] }
 0x145   : > { %v922_v27 = vadd.f32 %v3729_v51, %v915_v40  ;;  %v3733_v2 = vmax.f32 %v950_v12, %v966_v31  ;;  %v1030_v31 = vld [vmem:[#allocation2 + $0x158] sm:$0xff]  ;;  %4258 = vst [vmem:[#allocation17_spill] sm:$0xff] %v3761_v41  ;;  %v1060_v40 = vld [vmem:[#allocation2 + $0x248] sm:$0xff]  ;;  %v3781_v36 = vpack.c.bf16 %v1065_v55, %v1055_v0  ;;  %v1079_v53 = vld [vmem:[#allocation2 + $0x2e0] sm:$0xff] }
 0x146   : > { %v3759_v57 = vpack.c.bf16 %v1040_v37, %v1030_v31  ;;  %v1056_v12 = vld [vmem:[#allocation2 + $0x228] sm:$0xff]  ;;  %4260 = vst [vmem:[#allocation18_spill] sm:$0xff] %v3769_v25  ;;  %v3791_v5 = vpack.c.bf16 %v1079_v53, %v1069_v4  ;;  %v1089_v0 = vld [vmem:[#allocation2 + $0x330] sm:$0xff]  ;;  %v1099_v55 = vld [vmem:[#allocation2 + $0x380] sm:$0xff] }
 0x147   : > { %v3739_v44 = vmax.f32 %v922_v27, 0.0  ;;  %v3773_v27 = vpack.c.bf16 %v1060_v40, %v1050_v21  ;;  %v3775_v24 = vpack.c.bf16 %v1066_v63, %v1056_v12  ;;  %v1080_v31 = vld [vmem:[#allocation2 + $0x2e8] sm:$0xff]  ;;  %4262 = vst [vmem:[#allocation20_spill] sm:$0xff] %v3781_v36  ;;  %v1075_v40 = vld [vmem:[#allocation2 + $0x2c0] sm:$0xff]  ;;  %v1085_v12 = vld [vmem:[#allocation2 + $0x310] sm:$0xff]  ;;  %v3803_v4 = vpack.c.bf16 %v1099_v55, %v1089_v0 }
 0x148   : > { %v1076_v37 = vld [vmem:[#allocation2 + $0x2c8] sm:$0xff]  ;;  %v3785_v45 = vpack.c.bf16 %v1080_v31, %v1070_v60  ;;  %v1090_v63 = vld [vmem:[#allocation2 + $0x338] sm:$0xff]  ;;  %v3793_v61 = vpack.c.bf16 %v1085_v12, %v1075_v40  ;;  %v1109_v40 = vld [vmem:[#allocation2 + $0x3d0] sm:$0xff] }
 0x149   : > { %2473 = vmatmul.mubr.msk.f32.vlgmr.msra.gmra.mrb[20].mxu0 %vm1137_vm4, %v3739_v44  ;;  %2475 = vmatmul.mubr.msk.f32.vlgmr.msra.gmra.mrb[20].mxu1 %vm1137_vm4, %v3739_v44  ;;  %4261 = vst [vmem:[#allocation19_spill] sm:$0xff] %v3775_v24  ;;  %v3787_v21 = vpack.c.bf16 %v1086_v1, %v1076_v37  ;;  %v3797_v60 = vpack.c.bf16 %v1100_v56, %v1090_v63  ;;  %v1095_v37 = vld [vmem:[#allocation2 + $0x360] sm:$0xff]  ;;  %v1105_v1 = vld [vmem:[#allocation2 + $0x3b0] sm:$0xff] }
 0x14a   : > { %2766 = vmatpush1.bf16.msra.mxu0 %v3735_v48  ;;  %2850 = vmatpush1.bf16.msra.mxu1 %v3737_v17  ;;  %4264 = vst [vmem:[#allocation22_spill] sm:$0xff] %v3793_v61  ;;  %v3805_v53 = vpack.c.bf16 %v1105_v1, %v1095_v37  ;;  %v1115_v12 = vld [vmem:[#allocation2 + $0x400] sm:$0xff]  ;;  %v1125_v63 = vld [vmem:[#allocation2 + $0x450] sm:$0xff]  ;;  %v3821_v37 = vld [vmem:[#allocation2 + $0x478] sm:$0xff] }
 0x14b   : > { %2768 = vmatprep.subr.bf16.mxu0 %v3743_v49  ;;  %2852 = vmatprep.subr.bf16.mxu1 %v3745_v13  ;;  %4263 = vst [vmem:[#allocation21_spill] sm:$0xff] %v3787_v21  ;;  %v1116_v13 = vld [vmem:[#allocation2 + $0x408] sm:$0xff]  ;;  %v3817_v55 = vpack.c.bf16 %v1125_v63, %v1115_v12  ;;  %v993_v1 = vld [vmem:[#allocation2 + $0x30] sm:$0xff]  ;;  %v1014_v63 = vld [vmem:[#allocation2 + $0xd8] sm:$0xff] }
 0x14c   : > { %1276 = vmatprep.mubr.f32.mxu0 %v4259_v32  ;;  %1489 = vmatprep.mubr.f32.mxu1 %v4259_v32  ;;  %4266 = vst [vmem:[#allocation24_spill] sm:$0xff] %v3805_v53  ;;  %v1093_v17 = vld [vmem:[#allocation2 + $0x350] sm:$0xff] }
 0x14d   : > { %4268 = vst [vmem:[#allocation26_spill] sm:$0xff] %v3817_v55 }
 0x14e   : > { %2770 = vmatpush1.bf16.msra.mxu0 %v3753_v7  ;;  %2854 = vmatpush1.bf16.msra.mxu1 %v3755_v16  ;;  %v1120_v16 = vld [vmem:[#allocation2 + $0x428] sm:$0xff] }
 0x14f   : > { %2772 = vmatprep.subr.bf16.mxu0 %v3759_v57  ;;  %2856 = vmatprep.subr.bf16.mxu1 %v3761_v41  ;;  %v1096_v41 = vld [vmem:[#allocation2 + $0x368] sm:$0xff] }
 0x152   : > { %2774 = vmatpush1.bf16.msra.mxu0 %v3767_v19  ;;  %2858 = vmatpush1.bf16.msra.mxu1 %v3769_v25  ;;  %v1106_v25 = vld [vmem:[#allocation2 + $0x3b8] sm:$0xff] }
 0x153   : > { %2776 = vmatprep.subr.bf16.mxu0 %v3773_v27  ;;  %2860 = vmatprep.subr.bf16.mxu1 %v3775_v24  ;;  %v3799_v31 = vpack.c.bf16 %v1106_v25, %v1096_v41  ;;  %v1110_v24 = vld [vmem:[#allocation2 + $0x3d8] sm:$0xff]  ;;  %v1119_v25 = vld [vmem:[#allocation2 + $0x420] sm:$0xff] }
 0x154   : > { %v3809_v56 = vpack.c.bf16 %v1120_v16, %v1110_v24  ;;  %v3815_v0 = vpack.c.bf16 %v1119_v25, %v1109_v40  ;;  %v3823_v16 = vld [vmem:[#allocation2 + $0x4a8] sm:$0xff]  ;;  %v1003_v40 = vld [vmem:[#allocation2 + $0x80] sm:$0xff] }
 0x155   : > { %4265 = vst [vmem:[#allocation23_spill] sm:$0xff] %v3799_v31  ;;  %4269 = vst [vmem:[#allocation27_spill] sm:$0xff] %v3823_v16  ;;  %v1004_v24 = vld [vmem:[#allocation2 + $0x88] sm:$0xff]  ;;  %v3831_v25 = vld [vmem:[#allocation2 + $0x4a0] sm:$0xff] }
 0x156   : > { %2778 = vmatpush1.bf16.msra.mxu0 %v3779_v29  ;;  %2862 = vmatpush1.bf16.msra.mxu1 %v3781_v36  ;;  %v1126_v36 = vld [vmem:[#allocation2 + $0x458] sm:$0xff]  ;;  %4270 = vst [vmem:[#allocation28_spill] sm:$0xff] %v3831_v25 }
 0x157   : > { %2780 = vmatprep.subr.bf16.mxu0 %v3785_v45  ;;  %2864 = vmatprep.subr.bf16.mxu1 %v3787_v21  ;;  %v3811_v41 = vpack.c.bf16 %v1126_v36, %v1116_v13  ;;  %v994_v13 = vld [vmem:[#allocation2 + $0x38] sm:$0xff]  ;;  %v3827_v36 = vld [vmem:[#allocation2 + $0x470] sm:$0xff] }
 0x158   : > { %v3833_v12 = vpack.c.bf16 %v1004_v24, %v994_v13  ;;  %v1044_v13 = vld [vmem:[#allocation2 + $0x1c8] sm:$0xff]  ;;  %v1094_v21 = vld [vmem:[#allocation2 + $0x358] sm:$0xff] }
 0x159   : > { %4267 = vst [vmem:[#allocation25_spill] sm:$0xff] %v3811_v41 }
 0x15a   : > { %2782 = vmatpush1.bf16.msra.mxu0 %v3791_v5  ;;  %2866 = vmatpush1.bf16.msra.mxu1 %v3793_v61  ;;  %v1023_v61 = vld [vmem:[#allocation2 + $0x120] sm:$0xff] }
 0x15b   : > { %2784 = vmatprep.subr.bf16.mxu0 %v3797_v60  ;;  %2868 = vmatprep.subr.bf16.mxu1 %v3799_v31  ;;  %v1013_v31 = vld [vmem:[#allocation2 + $0xd0] sm:$0xff] }
 0x15e   : > { %2786 = vmatpush1.bf16.msra.mxu0 %v3803_v4  ;;  %2870 = vmatpush1.bf16.msra.mxu1 %v3805_v53  ;;  %v3835_v53 = vpack.c.bf16 %v1003_v40, %v993_v1  ;;  %v1033_v1 = vld [vmem:[#allocation2 + $0x170] sm:$0xff]  ;;  %v1043_v40 = vld [vmem:[#allocation2 + $0x1c0] sm:$0xff] }
 0x15f   : > { %2788 = vmatprep.subr.bf16.mxu0 %v3809_v56  ;;  %2872 = vmatprep.subr.bf16.mxu1 %v3811_v41  ;;  %v1024_v41 = vld [vmem:[#allocation2 + $0x128] sm:$0xff] }
 0x162   : > { %2790 = vmatpush1.bf16.msra.mxu0 %v3815_v0  ;;  %2874 = vmatpush1.bf16.msra.mxu1 %v3817_v55  ;;  %v3839_v55 = vpack.c.bf16 %v1024_v41, %v1014_v63  ;;  %v3849_v41 = vpack.c.bf16 %v1023_v61, %v1013_v31  ;;  %v1054_v63 = vld [vmem:[#allocation2 + $0x218] sm:$0xff]  ;;  %v1063_v61 = vld [vmem:[#allocation2 + $0x260] sm:$0xff] }
 0x163   : > { %1240 = vmatprep.subr.mxu0 %v3821_v37  ;;  %1453 = vmatprep.subr.mxu1 %v3823_v16  ;;  %v1034_v16 = vld [vmem:[#allocation2 + $0x178] sm:$0xff] }
 0x164   : > { %v3853_v24 = vpack.c.bf16 %v1044_v13, %v1034_v16  ;;  %v1074_v31 = vld [vmem:[#allocation2 + $0x2b8] sm:$0xff]  ;;  %v1084_v16 = vld [vmem:[#allocation2 + $0x308] sm:$0xff] }
 0x166   : > { %1241 = vmatpush1.msra.mxu0 %v3827_v36  ;;  %1454 = vmatpush1.msra.mxu1 %v3831_v25  ;;  %v1064_v25 = vld [vmem:[#allocation2 + $0x268] sm:$0xff] }
 0x167   : > { %2474 = vmatmul.mubr.msk.f32.vlgmr.msra.gmra.mrb[22].mxu0 %vm1137_vm4, %v3739_v44  ;;  %2820 = vmatprep.subr.bf16.mxu0 %v3833_v12 }
 0x168   : > { %2477 = vmatmul.mubr.msk.f32.vlgmr.msra.gmra.mrb[22].mxu1 %vm1137_vm4, %v3739_v44  ;;  %2904 = vmatprep.subr.bf16.mxu1 %v3715_v43  ;;  %v3859_v43 = vpack.c.bf16 %v1043_v40, %v1033_v1  ;;  %v1073_v1 = vld [vmem:[#allocation2 + $0x2b0] sm:$0xff]  ;;  %v1083_v40 = vld [vmem:[#allocation2 + $0x300] sm:$0xff] }
 0x169   : > { %2822 = vmatpush1.bf16.msra.mxu0 %v3835_v53  ;;  %2906 = vmatpush1.bf16.msra.mxu1 %v3735_v48  ;;  %v3863_v48 = vpack.c.bf16 %v1064_v25, %v1054_v63  ;;  %v2837_v25 = vpack.c.bf16 %v1083_v40, %v1073_v1 }
 0x16a   : > { %2824 = vmatprep.subr.bf16.mxu0 %v3839_v55  ;;  %2908 = vmatprep.subr.bf16.mxu1 %v3743_v49  ;;  %v1053_v49 = vld [vmem:[#allocation2 + $0x210] sm:$0xff] }
 0x16b   : > { %1418 = vmatprep.mubr.f32.mxu0 %v4259_v32  ;;  %1634 = vmatprep.mubr.f32.mxu1 %v4259_v32  ;;  %v2833_v13 = vpack.c.bf16 %v1063_v61, %v1053_v49  ;;  %v1114_v49 = vld [vmem:[#allocation2 + $0x3f8] sm:$0xff]  ;;  %v1124_v61 = vld [vmem:[#allocation2 + $0x448] sm:$0xff] }
 0x16d   : > { %2826 = vmatpush1.bf16.msra.mxu0 %v3849_v41  ;;  %2910 = vmatpush1.bf16.msra.mxu1 %v3753_v7  ;;  %v2835_v7 = vpack.c.bf16 %v1084_v16, %v1074_v31  ;;  %v2843_v31 = vpack.c.bf16 %v1124_v61, %v1114_v49  ;;  %v1113_v16 = vld [vmem:[#allocation2 + $0x3f0] sm:$0xff] }
 0x16e   : > { %2828 = vmatprep.subr.bf16.mxu0 %v3853_v24  ;;  %2912 = vmatprep.subr.bf16.mxu1 %v3759_v57  ;;  %v1104_v57 = vld [vmem:[#allocation2 + $0x3a8] sm:$0xff] }
 0x16f   : > { %v2839_v63 = vpack.c.bf16 %v1104_v57, %v1094_v21  ;;  %v4271_v21 = vmax.f32 %v3733_v2, %v3724_v52  ;;  %v1928_v2 = vld [vmem:[%s4205_s3 + $0x18] sm:$0xff] }
 0x171   : > { %2830 = vmatpush1.bf16.msra.mxu0 %v3859_v43  ;;  %2914 = vmatpush1.bf16.msra.mxu1 %v3767_v19  ;;  %v1103_v19 = vld [vmem:[#allocation2 + $0x3a0] sm:$0xff] }
 0x172   : > { %2832 = vmatprep.subr.bf16.mxu0 %v3863_v48  ;;  %2916 = vmatprep.subr.bf16.mxu1 %v3773_v27  ;;  %v2841_v27 = vpack.c.bf16 %v1103_v19, %v1093_v17  ;;  %v1133_v17 = vld [vmem:[#allocation2 + $0x490] sm:$0xff] }
 0x175   : > { %2834 = vmatpush1.bf16.msra.mxu0 %v2833_v13  ;;  %2918 = vmatpush1.bf16.msra.mxu1 %v3779_v29  ;;  %v2845_v29 = vpack.c.bf16 %v1123_v15, %v1113_v16  ;;  %v3252_v15 = vmov 0.0|0.0  }
 0x176   : > { %2836 = vmatprep.subr.bf16.mxu0 %v2835_v7  ;;  %2920 = vmatprep.subr.bf16.mxu1 %v3785_v45  ;;  %v1134_v45 = vld [vmem:[#allocation2 + $0x498] sm:$0xff] }
 0x179   : > { %2838 = vmatpush1.bf16.msra.mxu0 %v2837_v25  ;;  %2922 = vmatpush1.bf16.msra.mxu1 %v3791_v5  ;;  %v985_v5 = vadd.f32 %v3729_v51, %v4271_v21  ;;  %v1927_v51 = vld [vmem:[%s4205_s3 + $0x10] sm:$0xff] }
 0x17a   : > { %2840 = vmatprep.subr.bf16.mxu0 %v2839_v63  ;;  %2924 = vmatprep.subr.bf16.mxu1 %v3797_v60 }
 0x17b   : > { %v3881_v60 = vmax.f32 %v985_v5, 0.0 }
 0x17d   : > { %2842 = vmatpush1.bf16.msra.mxu0 %v2841_v27  ;;  %2926 = vmatpush1.bf16.msra.mxu1 %v3803_v4  ;;  %v1929_v4 = vld [vmem:[%s4205_s3 + $0x20] sm:$0xff] }
 0x17e   : > { %2844 = vmatprep.subr.bf16.mxu0 %v2843_v31  ;;  %2928 = vmatprep.subr.bf16.mxu1 %v3809_v56 }
 0x181   : > { %2846 = vmatpush1.bf16.msra.mxu0 %v2845_v29  ;;  %2930 = vmatpush1.bf16.msra.mxu1 %v3815_v0 }
 0x182   : > { %1382 = vmatprep.subr.mxu0 %v1134_v45  ;;  %1598 = vmatprep.subr.mxu1 %v3821_v37 }
 0x185   : > { %1383 = vmatpush1.msra.mxu0 %v1133_v17  ;;  %1599 = vmatpush1.msra.mxu1 %v3827_v36  ;;  %v1931_v36 = vld [vmem:[%s4205_s3 + $0x30] sm:$0xff] }
 0x186   : > { %2476 = vmatmul.mubr.msk.f32.vlgmr.msra.gmra.mrb[24].mxu0 %vm1137_vm4, %v3739_v44  ;;  %2876 = vmatprep.subr.bf16.mxu0 %v3620_v6  ;;  %v4272_v6 = vld [vmem:[#allocation8_spill] sm:$0xff]  ;;  %v3019_v44 = vpack.c.bf16 %v1928_v2, %v1927_v51 }
 0x187   : > { %2479 = vmatmul.mubr.msk.f32.vlgmr.msra.gmra.mrb[24].mxu1 %vm1137_vm4, %v3881_v60  ;;  %2960 = vmatprep.subr.bf16.mxu1 %v3833_v12 }
 0x188   : > { %2878 = vmatpush1.bf16.msra.mxu0 %v3624_v11  ;;  %2962 = vmatpush1.bf16.msra.mxu1 %v3835_v53  ;;  %v4274_v11 = vld [vmem:[#allocation10_spill] sm:$0xff] }
 0x189   : > { %2880 = vmatprep.subr.bf16.mxu0 %v3632_v18  ;;  %2964 = vmatprep.subr.bf16.mxu1 %v3839_v55  ;;  %v4276_v18 = vld [vmem:[#allocation12_spill] sm:$0xff]  ;;  %v1930_v53 = vld [vmem:[%s4205_s3 + $0x28] sm:$0xff] }
 0x18a   : > { %1563 = vmatprep.mubr.f32.mxu0 %v4259_v32  ;;  %1776 = vmatprep.mubr.f32.mxu1 %v4259_v32  ;;  %v3022_v56 = vpack.c.bf16 %v1930_v53, %v1929_v4 }
 0x18c   : > { %2882 = vmatpush1.bf16.msra.mxu0 %v3636_v23  ;;  %2966 = vmatpush1.bf16.msra.mxu1 %v3849_v41  ;;  %v4278_v23 = vld [vmem:[#allocation14_spill] sm:$0xff]  ;;  %v1932_v41 = vld [vmem:[%s4205_s3 + $0x38] sm:$0xff] }
 0x18d   : > { %2884 = vmatprep.subr.bf16.mxu0 %v3644_v30  ;;  %2968 = vmatprep.subr.bf16.mxu1 %v3853_v24  ;;  %v4280_v30 = vld [vmem:[#allocation16_spill] sm:$0xff]  ;;  %v3025_v24 = vpack.c.bf16 %v1932_v41, %v1931_v36 }
 0x18e   : > { %v2486_v41 = vld [vmem:[%s4205_s3 + $0x58] sm:$0xff] }
 0x190   : > { %2886 = vmatpush1.bf16.msra.mxu0 %v3648_v35  ;;  %2970 = vmatpush1.bf16.msra.mxu1 %v3859_v43  ;;  %v4282_v35 = vld [vmem:[#allocation18_spill] sm:$0xff]  ;;  %v1933_v43 = vld [vmem:[%s4205_s3 + $0x40] sm:$0xff] }
 0x191   : > { %2888 = vmatprep.subr.bf16.mxu0 %v3656_v42  ;;  %2972 = vmatprep.subr.bf16.mxu1 %v3863_v48  ;;  %v4284_v42 = vld [vmem:[#allocation20_spill] sm:$0xff]  ;;  %v1934_v48 = vld [vmem:[%s4205_s3 + $0x48] sm:$0xff] }
 0x194   : > { %2890 = vmatpush1.bf16.msra.mxu0 %v3660_v47  ;;  %2974 = vmatpush1.bf16.msra.mxu1 %v2833_v13  ;;  %v4286_v47 = vld [vmem:[#allocation22_spill] sm:$0xff]  ;;  %v3028_v13 = vpack.c.bf16 %v1934_v48, %v1933_v43  ;;  %v2487_v48 = vld [vmem:[%s4205_s3 + $0x60] sm:$0xff] }
 0x195   : > { %2892 = vmatprep.subr.bf16.mxu0 %v3668_v54  ;;  %2976 = vmatprep.subr.bf16.mxu1 %v2835_v7  ;;  %v4288_v54 = vld [vmem:[#allocation24_spill] sm:$0xff] }
 0x198   : > { %2894 = vmatpush1.bf16.msra.mxu0 %v3672_v59  ;;  %2978 = vmatpush1.bf16.msra.mxu1 %v2837_v25  ;;  %v4290_v59 = vld [vmem:[#allocation26_spill] sm:$0xff] }
 0x199   : > { %2896 = vmatprep.subr.bf16.mxu0 %v3680_v3  ;;  %2980 = vmatprep.subr.bf16.mxu1 %v2839_v63  ;;  %v4292_v3 = vld [vmem:[#allocation28_spill] sm:$0xff] }
 0x19c   : > { %2898 = vmatpush1.bf16.msra.mxu0 %v3684_v9  ;;  %2982 = vmatpush1.bf16.msra.mxu1 %v2841_v27  ;;  %v1926_v9 = vld [vmem:[%s4205_s3 + $0x8] sm:$0xff] }
 0x19d   : > { %2900 = vmatprep.subr.bf16.mxu0 %v3692_v20  ;;  %2984 = vmatprep.subr.bf16.mxu1 %v2843_v31 }
 0x1a0   : > { %2902 = vmatpush1.bf16.msra.mxu0 %v3696_v28  ;;  %2986 = vmatpush1.bf16.msra.mxu1 %v2845_v29 }
 0x1a1   : > { %1527 = vmatprep.subr.mxu0 %v3704_v33  ;;  %1740 = vmatprep.subr.mxu1 %v1134_v45 }
 0x1a4   : > { %1528 = vmatpush1.msra.mxu0 %v3710_v39  ;;  %1741 = vmatpush1.msra.mxu1 %v1133_v17 }
 0x1a5   : > { %2478 = vmatmul.mubr.msk.f32.vlgmr.msra.gmra.mrb[26].mxu0 %vm1137_vm4, %v3881_v60  ;;  %2932 = vmatprep.subr.bf16.mxu0 %v3622_v10  ;;  %v4273_v10 = vld [vmem:[#allocation9_spill] sm:$0xff] }
 0x1a6   : > { %2481 = vmatmul.mubr.msk.f32.vlgmr.msra.gmra.mrb[26].mxu1 %vm1137_vm4, %v3881_v60  ;;  %2934 = vmatpush1.bf16.msra.mxu0 %v3627_v14  ;;  %v4275_v14 = vld [vmem:[#allocation11_spill] sm:$0xff] }
 0x1a7   : > { %2936 = vmatprep.subr.bf16.mxu0 %v3634_v22  ;;  %1705 = vmatprep.mubr.f32.mxu0 %v4259_v32  ;;  %v4277_v22 = vld [vmem:[#allocation13_spill] sm:$0xff] }
 0x1a8   : > { %3015 = vmatprep.subr.bf16.mxu1 %v3252_v15  ;;  %2596 = vmatprep.mubr.msk.f32.mxu1 %vm3253_vm5, %v4259_v32 }
 0x1aa   : > { %2938 = vmatpush1.bf16.msra.mxu0 %v3639_v26  ;;  %v4279_v26 = vld [vmem:[#allocation15_spill] sm:$0xff] }
 0x1ab   : > { %2940 = vmatprep.subr.bf16.mxu0 %v3646_v34  ;;  %v4281_v34 = vld [vmem:[#allocation17_spill] sm:$0xff] }
 0x1ae   : > { %2942 = vmatpush1.bf16.msra.mxu0 %v3651_v38  ;;  %v4283_v38 = vld [vmem:[#allocation19_spill] sm:$0xff] }
 0x1af   : > { %2944 = vmatprep.subr.bf16.mxu0 %v3658_v46  ;;  %v4285_v46 = vld [vmem:[#allocation21_spill] sm:$0xff] }
 0x1b2   : > { %2946 = vmatpush1.bf16.msra.mxu0 %v3663_v50  ;;  %v4287_v50 = vld [vmem:[#allocation23_spill] sm:$0xff] }
 0x1b3   : > { %2948 = vmatprep.subr.bf16.mxu0 %v3670_v58  ;;  %v4289_v58 = vld [vmem:[#allocation25_spill] sm:$0xff] }
 0x1b6   : > { %2950 = vmatpush1.bf16.msra.mxu0 %v3675_v62  ;;  %v4291_v62 = vld [vmem:[#allocation27_spill] sm:$0xff] }
 0x1b7   : > { %2952 = vmatprep.subr.bf16.mxu0 %v3682_v8  ;;  %v1925_v8 = vld [vmem:[%s4205_s3] sm:$0xff] }
 0x1b8   : > { %v3016_v20 = vpack.c.bf16 %v1926_v9, %v1925_v8 }
 0x1ba   : > { %2954 = vmatpush1.bf16.msra.mxu0 %v4272_v6  ;;  %3017 = vmatpush3.bf16.msra.mxu1 %v3016_v20 }
 0x1bb   : > { %2956 = vmatprep.subr.bf16.mxu0 %v4273_v10  ;;  %3018 = vmatprep.subr.bf16.mxu1 %v3252_v15 }
 0x1be   : > { %2958 = vmatpush1.bf16.msra.mxu0 %v4274_v11  ;;  %3020 = vmatpush3.bf16.msra.mxu1 %v3019_v44 }
 0x1bf   : > { %1669 = vmatprep.subr.mxu0 %v4275_v14  ;;  %3021 = vmatprep.subr.bf16.mxu1 %v3252_v15 }
 0x1c2   : > { %1670 = vmatpush1.msra.mxu0 %v4276_v18  ;;  %3023 = vmatpush3.bf16.msra.mxu1 %v3022_v56 }
 0x1c3   : > { %2480 = vmatmul.mubr.msk.f32.vlgmr.msra.gmra.mrb[28].mxu0 %vm1137_vm4, %v3881_v60  ;;  %2988 = vmatprep.subr.bf16.mxu0 %v4277_v22 }
 0x1c4   : > { %2990 = vmatpush1.bf16.msra.mxu0 %v4278_v23  ;;  %1847 = vmatprep.mubr.f32.mxu0 %v4259_v32  ;;  %v2266_v23 = vld [vmem:[%s4206_s4] sm:$0xff] }
 0x1c5   : > { %2992 = vmatprep.subr.bf16.mxu0 %v4279_v26  ;;  %3024 = vmatprep.subr.bf16.mxu1 %v3252_v15  ;;  %v2267_v26 = vld [vmem:[%s4206_s4 + $0x8] sm:$0xff] }
 0x1c6   : > { %3026 = vmatpush3.bf16.msra.mxu1 %v3025_v24 }
 0x1c7   : > { %3027 = vmatprep.subr.bf16.mxu1 %v3252_v15 }
 0x1c8   : > { %2994 = vmatpush1.bf16.msra.mxu0 %v4280_v30  ;;  %v2268_v30 = vld [vmem:[%s4206_s4 + $0x10] sm:$0xff] }
 0x1c9   : > { %2996 = vmatprep.subr.bf16.mxu0 %v4281_v34  ;;  %v3076_v34 = vpack.c.bf16 %v2267_v26, %v2266_v23  ;;  %v2505_v23 = vld [vmem:[%s4205_s3 + $0xe8] sm:$0xff] }
 0x1ca   : > { %3029 = vmatpush3.bf16.msra.mxu1 %v3028_v13  ;;  %v2488_v13 = vld [vmem:[%s4205_s3 + $0x68] sm:$0xff] }
 0x1cb   : > { %3030 = vmatprep.subr.bf16.mxu1 %v3252_v15 }
 0x1cc   : > { %2998 = vmatpush1.bf16.msra.mxu0 %v4282_v35  ;;  %v2269_v35 = vld [vmem:[%s4206_s4 + $0x18] sm:$0xff] }
 0x1cd   : > { %3000 = vmatprep.subr.bf16.mxu0 %v4283_v38  ;;  %v3079_v38 = vpack.c.bf16 %v2269_v35, %v2268_v30  ;;  %v2507_v30 = vld [vmem:[%s4205_s3 + $0xf0] sm:$0xff] }
 0x1d0   : > { %3002 = vmatpush1.bf16.msra.mxu0 %v4284_v42  ;;  %v2270_v42 = vld [vmem:[%s4206_s4 + $0x20] sm:$0xff] }
 0x1d1   : > { %3004 = vmatprep.subr.bf16.mxu0 %v4285_v46  ;;  %v2271_v46 = vld [vmem:[%s4206_s4 + $0x28] sm:$0xff] }
 0x1d4   : > { %3006 = vmatpush1.bf16.msra.mxu0 %v4286_v47  ;;  %v3082_v47 = vpack.c.bf16 %v2271_v46, %v2270_v42  ;;  %v2509_v42 = vld [vmem:[%s4205_s3 + $0x100] sm:$0xff]  ;;  %v2510_v46 = vld [vmem:[%s4205_s3 + $0x108] sm:$0xff] }
 0x1d5   : > { %3008 = vmatprep.subr.bf16.mxu0 %v4287_v50 }
 0x1d8   : > { %3010 = vmatpush1.bf16.msra.mxu0 %v4288_v54 }
 0x1d9   : > { %3012 = vmatprep.subr.bf16.mxu0 %v4289_v58 }
 0x1dc   : > { %3014 = vmatpush1.bf16.msra.mxu0 %v4290_v59 }
 0x1dd   : > { %1811 = vmatprep.subr.mxu0 %v4291_v62 }
 0x1e0   : > { %1812 = vmatpush1.msra.mxu0 %v4292_v3 }
 0x1e1   : > { %2482 = vmatmul.mubr.msk.f32.vlgmr.msra.gmra.mrb[30].mxu0 %vm1137_vm4, %v3881_v60  ;;  %3075 = vmatprep.subr.bf16.mxu0 %v3252_v15 }
 0x1e2   : > { %2682 = vmatprep.mubr.msk.f32.mxu0 %vm3253_vm5, %v4259_v32  ;;  %3077 = vmatpush3.bf16.msra.mxu0 %v3076_v34  ;;  %v2508_v34 = vld [vmem:[%s4205_s3 + $0xf8] sm:$0xff] }
 0x1e3   : > { %3078 = vmatprep.subr.bf16.mxu0 %v3252_v15  ;;  %v3061_v35 = vpack.c.bf16 %v2508_v34, %v2507_v30 }
 0x1e6   : > { %3080 = vmatpush3.bf16.msra.mxu0 %v3079_v38 }
 0x1e7   : > { %3081 = vmatprep.subr.bf16.mxu0 %v3252_v15 }
 0x1ea   : > { %3083 = vmatpush3.bf16.msra.mxu0 %v3082_v47  ;;  %v3064_v47 = vpack.c.bf16 %v2510_v46, %v2509_v42 }
 0x1eb   : > { %2680 = vmatprep.subr.mxu0 %v4259_v32 }
 0x21c   : > { %v1207_v28 = vpop.f32.mrb[20].mxu0  ;;  %v1349_v33 = vpop.f32.mrb[20].mxu1 }
 0x21d   : > { %v1209_v39 = vpop.f32.mrb[21].mxu0  ;;  %v1351_v52 = vpop.f32.mrb[21].mxu1  ;;  %v1865_v14 = vrot.slane %v1349_v33, 2 }
 0x21e   : > { %v1883_v25 = vrot.slane %v1209_v39, 1 }
 0x23a   : > { %v1278_v0 = vpop.f32.mrb[22].mxu0 }
 0x23b   : > { %v3977_v55 = vpop.f32.mrb[22].mxu1  ;;  %v1280_v37 = vpop.f32.mrb[23].mxu0  ;;  %v1857_v31 = vrot.slane %v1278_v0, 1 }
 0x23c   : > { %v3983_v12 = vpop.f32.mrb[23].mxu1  ;;  %v1891_v5 = vrot.slane %v1280_v37, 2  ;;  %v1908_v9 = vrot.slane %v3977_v55, 2  ;;  %v2483_v37 = vld [vmem:[%s4208_s6] ss:$0 sm:$0xff]  ;;  %v2485_v55 = vld [vmem:[%s4205_s3 + $0x50] sm:$0xff] }
 0x23d   : > { %v1878_v2 = vrot.slane %v3983_v12, 2  ;;  %v3031_v12 = vpack.c.bf16 %v2486_v41, %v2485_v55 }
 0x259   : > { %v1420_v7 = vpop.f32.mrb[24].mxu0 }
 0x25a   : > { %v1636_v1 = vpop.f32.mrb[24].mxu1  ;;  %v1422_v40 = vpop.f32.mrb[25].mxu0  ;;  %v1900_v50 = vrot.slane %v1420_v7, 1  ;;  %v3034_v7 = vpack.c.bf16 %v2488_v13, %v2487_v48 }
 0x25b   : > { %v1638_v57 = vpop.f32.mrb[25].mxu1  ;;  %v1887_v19 = vrot.slane %v1636_v1, 1  ;;  %v1870_v16 = vrot.slane %v1422_v40, 1  ;;  %v2489_v1 = vld [vmem:[%s4205_s3 + $0x70] sm:$0xff]  ;;  %v2490_v40 = vld [vmem:[%s4205_s3 + $0x78] sm:$0xff] }
 0x25c   : > { %v1861_v60 = vrot.slane %v1638_v57, 1  ;;  %v3037_v57 = vpack.c.bf16 %v2490_v40, %v2489_v1 }
 0x278   : > { %v1565_v63 = vpop.f32.mrb[26].mxu0 }
 0x279   : > { %v1885_v49 = vadd.f32 %v1883_v25, %v1565_v63  ;;  %v1778_v61 = vpop.f32.mrb[26].mxu1  ;;  %v1567_v27 = vpop.f32.mrb[27].mxu0  ;;  %v2491_v25 = vld [vmem:[%s4205_s3 + $0x80] sm:$0xff]  ;;  %v2492_v63 = vld [vmem:[%s4205_s3 + $0x88] sm:$0xff] }
 0x27a   : > { %v1868_v29 = vadd.f32 %v1778_v61, %v1351_v52  ;;  %v1855_v45 = vadd.f32 %v1567_v27, %v1207_v28  ;;  %v1780_v21 = vpop.f32.mrb[27].mxu1  ;;  %v2494_v61 = vld [vmem:[%s4205_s3 + $0x98] sm:$0xff] }
 0x27b   : > { %v1889_v17 = vadd.f32 %v1887_v19, %v1885_v49  ;;  %v1904_v62 = vrot.slane %v1780_v21, 1  ;;  %v3040_v19 = vpack.c.bf16 %v2492_v63, %v2491_v25  ;;  %v2493_v49 = vld [vmem:[%s4205_s3 + $0x90] sm:$0xff] }
 0x27c   : > { %v1872_v6 = vadd.f32 %v1870_v16, %v1868_v29  ;;  %v1859_v10 = vadd.f32 %v1857_v31, %v1855_v45  ;;  %v3043_v27 = vpack.c.bf16 %v2494_v61, %v2493_v49  ;;  %v2496_v31 = vld [vmem:[%s4205_s3 + $0xa0] sm:$0xff]  ;;  %v2497_v16 = vld [vmem:[%s4205_s3 + $0xa8] sm:$0xff]  ;;  %v2498_v21 = vld [vmem:[%s4205_s3 + $0xb0] sm:$0xff] }
 0x27d   : > { %v1893_v11 = vadd.f32 %v1891_v5, %v1889_v17  ;;  %v3046_v29 = vpack.c.bf16 %v2497_v16, %v2496_v31  ;;  %v2499_v5 = vld [vmem:[%s4205_s3 + $0xb8] sm:$0xff] }
 0x27e   : > { %v1863_v18 = vadd.f32 %v1861_v60, %v1859_v10  ;;  %v3049_v17 = vpack.c.bf16 %v2499_v5, %v2498_v21  ;;  %v2500_v60 = vld [vmem:[%s4205_s3 + $0xc0] sm:$0xff] }
 0x280   : > { %v1867_v22 = vadd.f32 %v1865_v14, %v1863_v18  ;;  %v2503_v14 = vld [vmem:[%s4205_s3 + $0xd8] sm:$0xff] }
 0x296   : > { %v1707_v54 = vpop.f32.mrb[28].mxu0 }
 0x297   : > { %v1895_v58 = vrot.slane %v1707_v54, 2  ;;  %v1709_v59 = vpop.f32.mrb[29].mxu0  ;;  %v2512_v54 = vld [vmem:[%s4205_s3 + $0x118] sm:$0xff] }
 0x298   : > { %v1902_v3 = vadd.f32 %v1900_v50, %v1709_v59  ;;  %v2511_v50 = vld [vmem:[%s4205_s3 + $0x110] sm:$0xff]  ;;  %v2513_v59 = vld [vmem:[%s4205_s3 + $0x120] sm:$0xff] }
 0x299   : > { %v1897_v8 = vadd.f32 %v1895_v58, %v1893_v11  ;;  %v2502_v11 = vld [vmem:[%s4205_s3 + $0xd0] sm:$0xff]  ;;  %v3067_v58 = vpack.c.bf16 %v2512_v54, %v2511_v50 }
 0x29a   : > { %v1906_v20 = vadd.f32 %v1904_v62, %v1902_v3  ;;  %v3055_v18 = vpack.c.bf16 %v2503_v14, %v2502_v11  ;;  %v2515_v3 = vld [vmem:[%s4205_s3 + $0x130] sm:$0xff] }
 0x29c   : > { %v1910_v28 = vadd.f32 %v1908_v9, %v1906_v20 }
 0x2b4   : > { %v1849_v33 = vpop.f32.mrb[30].mxu0 }
 0x2b5   : > { %v1874_v39 = vrot.slane %v1849_v33, 1  ;;  %v1851_v52 = vpop.f32.mrb[31].mxu0  ;;  %v1924_v33 = vld [vmem:[%s4209_s7] sm:$0x1] }
 0x2b6   : > { %v1912_v51 = vrot.slane %v1851_v52, 2 }
 0x2b7   : > { %v1876_v44 = vadd.f32 %v1874_v39, %v1872_v6  ;;  %v2501_v6 = vld [vmem:[%s4205_s3 + $0xc8] sm:$0xff] }
 0x2b8   : > { %v1914_v4 = vadd.f32 %v1912_v51, %v1910_v28  ;;  %v3052_v10 = vpack.c.bf16 %v2501_v6, %v2500_v60  ;;  %v2272_v28 = vld [vmem:[%s4206_s4 + $0x30] sm:$0x3] }
 0x2b9   : > { %v1880_v53 = vadd.f32 %v1878_v2, %v1876_v44  ;;  %2681 = vmatpush3.msk.msra.mxu0 %vm2277_vm7, %v2272_v28 }
 0x2bb   : > { %v1881_v56 = vmax.f32 %v1867_v22, %v1880_v53  ;;  %v2504_v22 = vld [vmem:[%s4205_s3 + $0xe0] sm:$0xff] }
 0x2bc   : > { %v3058_v26 = vpack.c.bf16 %v2505_v23, %v2504_v22 }
 0x2bd   : > { %v1898_v0 = vmax.f32 %v1881_v56, %v1897_v8  ;;  %v2516_v8 = vld [vmem:[%s4205_s3 + $0x138] sm:$0xff] }
 0x2be   : > { %v3073_v9 = vpack.c.bf16 %v2516_v8, %v2515_v3 }
 0x2bf   : > { %v1915_v36 = vmax.f32 %v1898_v0, %v1914_v4 }
 0x2c1   : > { %v1922_v24 = vadd.f32 %v2483_v37, %v1915_v36 }
 0x2c3   : > { %v4032_v43 = vmax.f32 %v1922_v24, 0.0 }
 0x2c5   : > { %2597 = vmatmul.mubr.msk.f32.vlgmr.msra.gmra.mrb[28].mxu1 %vm1935_vm6, %v4032_v43  ;;  %v2021_v45 = vrot.slane %v4032_v43, 1  ;;  %v2106_v38 = vrot.slane %v4032_v43, 2  ;;  %v2191_v20 = vrot.slane %v4032_v43, 3 }
 0x2c6   : > { %3032 = vmatpush3.bf16.msra.mxu1 %v3031_v12  ;;  %2619 = vmatprep.mubr.msk.f32.mxu1 %vm3253_vm5, %v4259_v32 }
 0x2c7   : > { %3033 = vmatprep.subr.bf16.mxu1 %v3252_v15 }
 0x2ca   : > { %3035 = vmatpush3.bf16.msra.mxu1 %v3034_v7 }
 0x2cb   : > { %3036 = vmatprep.subr.bf16.mxu1 %v3252_v15 }
 0x2ce   : > { %3038 = vmatpush3.bf16.msra.mxu1 %v3037_v57 }
 0x2cf   : > { %3039 = vmatprep.subr.bf16.mxu1 %v3252_v15 }
 0x2d2   : > { %3041 = vmatpush3.bf16.msra.mxu1 %v3040_v19 }
 0x2d3   : > { %3042 = vmatprep.subr.bf16.mxu1 %v3252_v15 }
 0x2d6   : > { %3044 = vmatpush3.bf16.msra.mxu1 %v3043_v27 }
 0x2d7   : > { %3045 = vmatprep.subr.bf16.mxu1 %v3252_v15 }
 0x2d9   : > { %2620 = vmatmul.mubr.msk.f32.vlgmr.msra.gmra.mrb[28].mxu1 %vm1935_vm6, %v2021_v45 }
 0x2da   : > { %3047 = vmatpush3.bf16.msra.mxu1 %v3046_v29  ;;  %2642 = vmatprep.mubr.msk.f32.mxu1 %vm3253_vm5, %v4259_v32 }
 0x2db   : > { %3048 = vmatprep.subr.bf16.mxu1 %v3252_v15 }
 0x2de   : > { %3050 = vmatpush3.bf16.msra.mxu1 %v3049_v17 }
 0x2df   : > { %3051 = vmatprep.subr.bf16.mxu1 %v3252_v15 }
 0x2e2   : > { %3053 = vmatpush3.bf16.msra.mxu1 %v3052_v10 }
 0x2e3   : > { %3054 = vmatprep.subr.bf16.mxu1 %v3252_v15 }
 0x2e6   : > { %3056 = vmatpush3.bf16.msra.mxu1 %v3055_v18 }
 0x2e7   : > { %3057 = vmatprep.subr.bf16.mxu1 %v3252_v15 }
 0x2ea   : > { %3059 = vmatpush3.bf16.msra.mxu1 %v3058_v26 }
 0x2eb   : > { %3060 = vmatprep.subr.bf16.mxu1 %v3252_v15 }
 0x2ed   : > { %2643 = vmatmul.mubr.msk.f32.vlgmr.msra.gmra.mrb[28].mxu1 %vm1935_vm6, %v2106_v38 }
 0x2ee   : > { %3062 = vmatpush3.bf16.msra.mxu1 %v3061_v35  ;;  %2665 = vmatprep.mubr.msk.f32.mxu1 %vm3253_vm5, %v4259_v32  ;;  %v2514_v32 = vld [vmem:[%s4205_s3 + $0x128] sm:$0xff] }
 0x2ef   : > { %3063 = vmatprep.subr.bf16.mxu1 %v3252_v15  ;;  %v3070_v62 = vpack.c.bf16 %v2514_v32, %v2513_v59 }
 0x2f2   : > { %3065 = vmatpush3.bf16.msra.mxu1 %v3064_v47 }
 0x2f3   : > { %3066 = vmatprep.subr.bf16.mxu1 %v3252_v15 }
 0x2f6   : > { %3068 = vmatpush3.bf16.msra.mxu1 %v3067_v58 }
 0x2f7   : > { %3069 = vmatprep.subr.bf16.mxu1 %v3252_v15 }
 0x2fa   : > { %3071 = vmatpush3.bf16.msra.mxu1 %v3070_v62 }
 0x2fb   : > { %3072 = vmatprep.subr.bf16.mxu1 %v3252_v15  ;;  %v2265_v15 = vld [vmem:[%s4210_s8] sm:$0x1] }
 0x2fe   : > { %3074 = vmatpush3.bf16.msra.mxu1 %v3073_v9 }
 0x301   : > { %2666 = vmatmul.mubr.msk.f32.vlgmr.msra.gmra.mrb[28].mxu1 %vm1935_vm6, %v2191_v20 }
 0x3d4   : > { %v2260_v39 = vpop.f32.mrb[28].mxu1 }
 0x3d5   : > { %v3088_v52 = vadd.f32 %v2260_v39, %v1924_v33  ;;  %v2667_v51 = vpop.f32.mrb[29].mxu1 }
 0x3d7   : > { %2683 = vmatmul.mubr.msk.f32.vlgmr.msra.gmra.mrb[32].mxu0 %vm2273_vm8, %v3088_v52 }
 0x4aa   : > { %v2347_v2 = vpop.f32.mrb[32].mxu0 }
 0x4ab   : > { %v2351_v44 = vadd.f32 %v2347_v2, %v2265_v15  ;;  %v2684_v4 = vpop.f32.mrb[33].mxu0 }
 0x4ad   : > { %2353 = vst.msk [vmem:[%s339_s21] sm:$0x1] %vm2352_vm9, %v2351_v44 }
 0x4ae   : > { %3192 = shalt.err (!%p3189_p7)
}
 0x4af   : > { %s3193_s25 = scalar_lea.hbm %s4160_s29, 16  ;;  %s3197_s0 = scalar_lea.hbm %s4211_s9, 32 }
 0x4b0   : > { %p3194_p8 = scmp.ne.s32.totalorder %s4160_s29, %s3193_s25  ;;  %p3198_p1 = scmp.lt.u32.totalorder %s4160_s29, %s4211_s9 }
 0x4b1   : > { %p3199_p0 = scmp.lt.u32.totalorder %s3197_s0, %s3193_s25  ;;  %p3201_p6 = scmp.lt.u32.totalorder %s3193_s25, %s4160_s29 }
 0x4b2   : > { %p3195_p11 = pnand %p3194_p8, %p4293_p9 }
 0x4b3   : > { %p3200_p5 = por %p3199_p0, %p3198_p1 }
 0x4b4   : > { %p3196_p13 = pneg %p3195_p11 }
 0x4b5   : > { %p3202_p10 = por %p3201_p6, %p3200_p5 }
 0x4b7   : > { %p3203_p12 = pnand %p3202_p10, %p3196_p13 }
 0x4b9   : > { %3206 = shalt.err (!%p3203_p12)
}
 0x4ba   : > { %3099 = dma.vmem_to_hbm [thread:$0]  (%p4293_p9), %s4162_s23, 16, %s4160_s29, %s2355_s16  }
 0x4bb PF: > { %p3111_p2 = scmp.ge.s32.totalorder %s3245_s12, 2  ;;  %s2379_s24 = sand.u32 1, %s3233_s30  }
 0x4bc   : > { %p4294_p3 = scmp.ne.s32.totalorder %s4240_s20, 0  ;;  %s2380_s14 = scalar_lea.sflag [#allocation4], %s2379_s24 }
 0x4be   : > { %p3106_p4 = pnand %p3111_p2, %p4294_p3 }
 0x4c0   : > { %3228 = dma.done.wait (!%p3106_p4), %s2380_s14, 16  }
 0x4c1   : > { %3230 = vsyncadd (!%p3106_p4), %s2380_s14, 4294967280  ;;  %p20_p7 = scmp.ge.s32.totalorder %s3330_s15, 4   ;;  %s4295_s30 = smov %s3237_s10 }
 0x4c2   : > { %s4296_s10 = smov %s3241_s11  ;;  %s4297_s11 = smov %s3341_s18 }
 0x4c3   : > { %s4298_s12 = smov %s3330_s15  ;;  %22 = sbr.rel (!%p20_p7) target bundleno = 6 (0x6), region = 99 }
 0x4ca   :  { %2384 = vsyncpa [#allocation3], 1 }
 0x4cb   :  { %2386 = vsyncpa [#allocation3 + $0x1], 1 }
 0x4cc   :  { %2387 = vsyncpa [#allocation4], 1 }
 0x4cd   :  { %2389 = vsyncpa [#allocation4 + $0x1], 1 }

</bundles_post_ra>
